<compile_context>
chip_gen: v5e
topology: v5e:2x2
jax: 0.10.0
libtpu: 0.0.40
codegen_flags: <defaults>
</compile_context>

<pallas_src>
import jax
import jax.numpy as jnp
import numpy as np
from jax.experimental import pallas as pl
from jax.experimental.pallas import tpu as pltpu

SEQ = 44      # timesteps == number of heads == scale-MLP input dim
IN_DIM = 44
H1 = 64
HID = 128     # RNN input_size == hidden_size
HEAD_H = 64
OUT = 3


def policy_kernel(x_ref, w1_ref, b1_ref, w2_ref, b2_ref,
                  wih_ref, brnn_ref, whh_ref, w34_ref, b34_ref,
                  out_ref, h_all):
    B = x_ref.shape[0]
    x = x_ref[...].astype(jnp.float32)

    # scale: Linear(44,64) -> tanh -> Linear(64,128) -> tanh
    h1 = jnp.tanh(jnp.dot(x, w1_ref[...],
                          preferred_element_type=jnp.float32) + b1_ref[...])
    emb = jnp.tanh(jnp.dot(h1, w2_ref[...],
                           preferred_element_type=jnp.float32) + b2_ref[...])

    # RNN input projection is identical at every timestep (input repeated 44x),
    # so compute it once outside the recurrence.  brnn = bih + bhh (prefused).
    x_proj = (jnp.dot(emb, wih_ref[...], preferred_element_type=jnp.float32)
              + brnn_ref[...])

    whh = whh_ref[...]
    h = jnp.zeros((B, HID), jnp.float32)

    # Serial recurrence: only matmul + add + tanh on the critical path.
    # Statically unrolled (SEQ=44) so the scheduler sees across iterations;
    # the h_t stashes are independent of the carried value's critical path.
    for t in range(SEQ):
        h = jnp.tanh(x_proj + jnp.dot(h, whh,
                                      preferred_element_type=jnp.float32))
        h_all[t * B:(t + 1) * B, :] = h

    # One lane-dense head matmul for all timesteps, off the critical path:
    # (SEQ*B, HID) @ (HID, SEQ*OUT).  Only the per-t diagonal (B, OUT) blocks
    # are meaningful; they are sliced out in the JAX wrapper.  The redundant
    # MACs (~6M) are a single cheap MXU call, far cheaper than 44 lane-sparse
    # (B,3) masked stores.
    out_ref[...] = (jnp.dot(h_all[...], w34_ref[...],
                            preferred_element_type=jnp.float32)
                    + b34_ref[...]).astype(out_ref.dtype)


def _policy_forward_impl(x, params):
    w1, b1, w2, b2, wih, bih, whh, bhh, w3, b3, w4, b4 = params
    B = x.shape[0]

    # Algebraic head fusion (exact up to f32 reassociation): there is no
    # nonlinearity between trans[t]'s two Linears.
    w34 = jnp.einsum('thk,tko->tho', w3, w4)              # (SEQ, HID, OUT)
    b34 = jnp.einsum('tik,tko->tio', b3, w4) + b4         # (SEQ, 1, OUT)
    w34_cat = jnp.transpose(w34, (1, 0, 2)).reshape(HID, SEQ * OUT)  # (128,132)
    b34_cat = b34.reshape(1, SEQ * OUT)                               # (1,132)
    brnn = bih + bhh                                                  # (1,128)

    vmem = pl.BlockSpec(memory_space=pltpu.MemorySpace.VMEM)
    slab = pl.pallas_call(
        policy_kernel,
        out_shape=jax.ShapeDtypeStruct((SEQ * B, SEQ * OUT), jnp.float32),
        in_specs=[vmem] * 10,
        out_specs=vmem,
        scratch_shapes=[pltpu.VMEM((SEQ * B, HID), jnp.float32)],
    )(x, w1, b1, w2, b2, wih, brnn, whh, w34_cat, b34_cat)

    # Pull the per-timestep diagonal blocks: out[t, b, :] = slab block (t, t).
    slab = slab.reshape(SEQ, B, SEQ, OUT)
    out = slab[jnp.arange(SEQ), :, jnp.arange(SEQ), :]    # (SEQ, B, OUT)
    return out


policy_forward = jax.jit(_policy_forward_impl)


def reference_forward(x, params):
    """Pure-JAX reference mirroring the torch module exactly (unfused heads)."""
    w1, b1, w2, b2, wih, bih, whh, bhh, w3, b3, w4, b4 = params
    emb = jnp.tanh(jnp.tanh(x @ w1 + b1) @ w2 + b2)
    x_proj = emb @ wih + bih + bhh
    h = jnp.zeros((x.shape[0], HID), jnp.float32)
    outs = []
    for t in range(SEQ):
        h = jnp.tanh(x_proj + h @ whh)
        y = (h @ w3[t] + b3[t]) @ w4[t] + b4[t]
        outs.append(y)
    return jnp.stack(outs, axis=0)


def init_params(key):
    """Deterministic init (torch-style uniform(-1/sqrt(fan_in), 1/sqrt(fan_in)))."""
    ks = jax.random.split(key, 12)

    def unif(k, shape, fan_in):
        b = 1.0 / np.sqrt(fan_in)
        return jax.random.uniform(k, shape, jnp.float32, -b, b)

    w1 = unif(ks[0], (IN_DIM, H1), IN_DIM)
    b1 = unif(ks[1], (1, H1), IN_DIM)
    w2 = unif(ks[2], (H1, HID), H1)
    b2 = unif(ks[3], (1, HID), H1)
    wih = unif(ks[4], (HID, HID), HID)
    bih = unif(ks[5], (1, HID), HID)
    whh = unif(ks[6], (HID, HID), HID)
    bhh = unif(ks[7], (1, HID), HID)
    w3 = unif(ks[8], (SEQ, HID, HEAD_H), HID)
    b3 = unif(ks[9], (SEQ, 1, HEAD_H), HID)
    w4 = unif(ks[10], (SEQ, HEAD_H, OUT), HEAD_H)
    b4 = unif(ks[11], (SEQ, 1, OUT), HEAD_H)
    return (w1, b1, w2, b2, wih, bih, whh, bhh, w3, b3, w4, b4)


if __name__ == "__main__":
    key = jax.random.PRNGKey(0)
    k_param, k_x = jax.random.split(key)
    params = init_params(k_param)

    B = 8  # multiple of 8 so every h_t is a whole sublane-aligned f32 vreg
    x = jax.random.normal(k_x, (B, IN_DIM), jnp.float32)

    out = policy_forward(x, params)
    out = jax.block_until_ready(out)

    ref = reference_forward(x, params)
    assert out.shape == (SEQ, B, OUT), out.shape
    np.testing.assert_allclose(np.asarray(out), np.asarray(ref),
                               rtol=1e-4, atol=1e-4)
    print("KERNEL_OK")
</pallas_src>

<mosaic_0001>
module attributes {stable_mosaic.version = 11 : i64} {
  func.func @policy_kernel(%arg0: memref<8x44xf32, #tpu.memory_space<vmem>>, %arg1: memref<44x64xf32, #tpu.memory_space<vmem>>, %arg2: memref<1x64xf32, #tpu.memory_space<vmem>>, %arg3: memref<64x128xf32, #tpu.memory_space<vmem>>, %arg4: memref<1x128xf32, #tpu.memory_space<vmem>>, %arg5: memref<128x128xf32, #tpu.memory_space<vmem>>, %arg6: memref<1x128xf32, #tpu.memory_space<vmem>>, %arg7: memref<128x128xf32, #tpu.memory_space<vmem>>, %arg8: memref<128x132xf32, #tpu.memory_space<vmem>>, %arg9: memref<1x132xf32, #tpu.memory_space<vmem>>, %arg10: memref<352x132xf32, #tpu.memory_space<vmem>>, %arg11: memref<352x128xf32, #tpu.memory_space<vmem>>) attributes {dimension_semantics = [], scalar_prefetch = 0 : i64, scratch_operands = 1 : i64, tpu.core_type = #tpu.core_type<tc>} {
    %c0 = arith.constant 0 : index
    %c0_0 = arith.constant 0 : index
    %0 = vector.load %arg0[%c0, %c0_0] : memref<8x44xf32, #tpu.memory_space<vmem>>, vector<8x44xf32>
    %c0_1 = arith.constant 0 : index
    %c0_2 = arith.constant 0 : index
    %1 = vector.load %arg1[%c0_1, %c0_2] : memref<44x64xf32, #tpu.memory_space<vmem>>, vector<44x64xf32>
    %cst = arith.constant dense<0.000000e+00> : vector<8x64xf32>
    %2 = tpu.matmul %0, %1, %cst {dimension_numbers = #tpu.dot_dimension_numbers<[1], [0], [0], [1], [0, 0, 1, 1], [], []>} : vector<8x44xf32>, vector<44x64xf32>, vector<8x64xf32> -> vector<8x64xf32>
    %c0_3 = arith.constant 0 : index
    %c0_4 = arith.constant 0 : index
    %3 = vector.load %arg2[%c0_3, %c0_4] : memref<1x64xf32, #tpu.memory_space<vmem>>, vector<1x64xf32>
    %4 = vector.broadcast %3 : vector<1x64xf32> to vector<8x64xf32>
    %5 = arith.addf %2, %4 : vector<8x64xf32>
    %6 = math.tanh %5 : vector<8x64xf32>
    %c0_5 = arith.constant 0 : index
    %c0_6 = arith.constant 0 : index
    %7 = vector.load %arg3[%c0_5, %c0_6] : memref<64x128xf32, #tpu.memory_space<vmem>>, vector<64x128xf32>
    %cst_7 = arith.constant dense<0.000000e+00> : vector<8x128xf32>
    %8 = tpu.matmul %6, %7, %cst_7 {dimension_numbers = #tpu.dot_dimension_numbers<[1], [0], [0], [1], [0, 0, 1, 1], [], []>} : vector<8x64xf32>, vector<64x128xf32>, vector<8x128xf32> -> vector<8x128xf32>
    %c0_8 = arith.constant 0 : index
    %c0_9 = arith.constant 0 : index
    %9 = vector.load %arg4[%c0_8, %c0_9] : memref<1x128xf32, #tpu.memory_space<vmem>>, vector<1x128xf32>
    %10 = vector.broadcast %9 : vector<1x128xf32> to vector<8x128xf32>
    %11 = arith.addf %8, %10 : vector<8x128xf32>
    %12 = math.tanh %11 : vector<8x128xf32>
    %c0_10 = arith.constant 0 : index
    %c0_11 = arith.constant 0 : index
    %13 = vector.load %arg5[%c0_10, %c0_11] : memref<128x128xf32, #tpu.memory_space<vmem>>, vector<128x128xf32>
    %cst_12 = arith.constant dense<0.000000e+00> : vector<8x128xf32>
    %14 = tpu.matmul %12, %13, %cst_12 {dimension_numbers = #tpu.dot_dimension_numbers<[1], [0], [0], [1], [0, 0, 1, 1], [], []>} : vector<8x128xf32>, vector<128x128xf32>, vector<8x128xf32> -> vector<8x128xf32>
    %c0_13 = arith.constant 0 : index
    %c0_14 = arith.constant 0 : index
    %15 = vector.load %arg6[%c0_13, %c0_14] : memref<1x128xf32, #tpu.memory_space<vmem>>, vector<1x128xf32>
    %16 = vector.broadcast %15 : vector<1x128xf32> to vector<8x128xf32>
    %17 = arith.addf %14, %16 : vector<8x128xf32>
    %c0_15 = arith.constant 0 : index
    %c0_16 = arith.constant 0 : index
    %18 = vector.load %arg7[%c0_15, %c0_16] : memref<128x128xf32, #tpu.memory_space<vmem>>, vector<128x128xf32>
    %cst_17 = arith.constant 0.000000e+00 : f32
    %19 = vector.broadcast %cst_17 : f32 to vector<8x128xf32>
    %cst_18 = arith.constant dense<0.000000e+00> : vector<8x128xf32>
    %20 = tpu.matmul %19, %18, %cst_18 {dimension_numbers = #tpu.dot_dimension_numbers<[1], [0], [0], [1], [0, 0, 1, 1], [], []>} : vector<8x128xf32>, vector<128x128xf32>, vector<8x128xf32> -> vector<8x128xf32>
    %21 = arith.addf %17, %20 : vector<8x128xf32>
    %22 = math.tanh %21 : vector<8x128xf32>
    %c0_19 = arith.constant 0 : index
    %c0_20 = arith.constant 0 : index
    %23 = vector.load %arg11[%c0_19, %c0_20] : memref<352x128xf32, #tpu.memory_space<vmem>>, vector<8x128xf32>
    tpu.vector_store %arg11[%c0_19, %c0_20], %22 {strides = array<i32>} : memref<352x128xf32, #tpu.memory_space<vmem>>, vector<8x128xf32>,
    %cst_21 = arith.constant dense<0.000000e+00> : vector<8x128xf32>
    %24 = tpu.matmul %22, %18, %cst_21 {dimension_numbers = #tpu.dot_dimension_numbers<[1], [0], [0], [1], [0, 0, 1, 1], [], []>} : vector<8x128xf32>, vector<128x128xf32>, vector<8x128xf32> -> vector<8x128xf32>
    %25 = arith.addf %17, %24 : vector<8x128xf32>
    %26 = math.tanh %25 : vector<8x128xf32>
    %c8 = arith.constant 8 : index
    %c0_22 = arith.constant 0 : index
    %27 = vector.load %arg11[%c8, %c0_22] : memref<352x128xf32, #tpu.memory_space<vmem>>, vector<8x128xf32>
    tpu.vector_store %arg11[%c8, %c0_22], %26 {strides = array<i32>} : memref<352x128xf32, #tpu.memory_space<vmem>>, vector<8x128xf32>,
    %cst_23 = arith.constant dense<0.000000e+00> : vector<8x128xf32>
    %28 = tpu.matmul %26, %18, %cst_23 {dimension_numbers = #tpu.dot_dimension_numbers<[1], [0], [0], [1], [0, 0, 1, 1], [], []>} : vector<8x128xf32>, vector<128x128xf32>, vector<8x128xf32> -> vector<8x128xf32>
    %29 = arith.addf %17, %28 : vector<8x128xf32>
    %30 = math.tanh %29 : vector<8x128xf32>
    %c16 = arith.constant 16 : index
    %c0_24 = arith.constant 0 : index
    %31 = vector.load %arg11[%c16, %c0_24] : memref<352x128xf32, #tpu.memory_space<vmem>>, vector<8x128xf32>
    tpu.vector_store %arg11[%c16, %c0_24], %30 {strides = array<i32>} : memref<352x128xf32, #tpu.memory_space<vmem>>, vector<8x128xf32>,
    %cst_25 = arith.constant dense<0.000000e+00> : vector<8x128xf32>
    %32 = tpu.matmul %30, %18, %cst_25 {dimension_numbers = #tpu.dot_dimension_numbers<[1], [0], [0], [1], [0, 0, 1, 1], [], []>} : vector<8x128xf32>, vector<128x128xf32>, vector<8x128xf32> -> vector<8x128xf32>
    %33 = arith.addf %17, %32 : vector<8x128xf32>
    %34 = math.tanh %33 : vector<8x128xf32>
    %c24 = arith.constant 24 : index
    %c0_26 = arith.constant 0 : index
    %35 = vector.load %arg11[%c24, %c0_26] : memref<352x128xf32, #tpu.memory_space<vmem>>, vector<8x128xf32>
    tpu.vector_store %arg11[%c24, %c0_26], %34 {strides = array<i32>} : memref<352x128xf32, #tpu.memory_space<vmem>>, vector<8x128xf32>,
    %cst_27 = arith.constant dense<0.000000e+00> : vector<8x128xf32>
    %36 = tpu.matmul %34, %18, %cst_27 {dimension_numbers = #tpu.dot_dimension_numbers<[1], [0], [0], [1], [0, 0, 1, 1], [], []>} : vector<8x128xf32>, vector<128x128xf32>, vector<8x128xf32> -> vector<8x128xf32>
    %37 = arith.addf %17, %36 : vector<8x128xf32>
    %38 = math.tanh %37 : vector<8x128xf32>
    %c32 = arith.constant 32 : index
    %c0_28 = arith.constant 0 : index
    %39 = vector.load %arg11[%c32, %c0_28] : memref<352x128xf32, #tpu.memory_space<vmem>>, vector<8x128xf32>
    tpu.vector_store %arg11[%c32, %c0_28], %38 {strides = array<i32>} : memref<352x128xf32, #tpu.memory_space<vmem>>, vector<8x128xf32>,
    %cst_29 = arith.constant dense<0.000000e+00> : vector<8x128xf32>
    %40 = tpu.matmul %38, %18, %cst_29 {dimension_numbers = #tpu.dot_dimension_numbers<[1], [0], [0], [1], [0, 0, 1, 1], [], []>} : vector<8x128xf32>, vector<128x128xf32>, vector<8x128xf32> -> vector<8x128xf32>
    %41 = arith.addf %17, %40 : vector<8x128xf32>
    %42 = math.tanh %41 : vector<8x128xf32>
    %c40 = arith.constant 40 : index
    %c0_30 = arith.constant 0 : index
    %43 = vector.load %arg11[%c40, %c0_30] : memref<352x128xf32, #tpu.memory_space<vmem>>, vector<8x128xf32>
    tpu.vector_store %arg11[%c40, %c0_30], %42 {strides = array<i32>} : memref<352x128xf32, #tpu.memory_space<vmem>>, vector<8x128xf32>,
    %cst_31 = arith.constant dense<0.000000e+00> : vector<8x128xf32>
    %44 = tpu.matmul %42, %18, %cst_31 {dimension_numbers = #tpu.dot_dimension_numbers<[1], [0], [0], [1], [0, 0, 1, 1], [], []>} : vector<8x128xf32>, vector<128x128xf32>, vector<8x128xf32> -> vector<8x128xf32>
    %45 = arith.addf %17, %44 : vector<8x128xf32>
    %46 = math.tanh %45 : vector<8x128xf32>
    %c48 = arith.constant 48 : index
    %c0_32 = arith.constant 0 : index
    %47 = vector.load %arg11[%c48, %c0_32] : memref<352x128xf32, #tpu.memory_space<vmem>>, vector<8x128xf32>
    tpu.vector_store %arg11[%c48, %c0_32], %46 {strides = array<i32>} : memref<352x128xf32, #tpu.memory_space<vmem>>, vector<8x128xf32>,
    %cst_33 = arith.constant dense<0.000000e+00> : vector<8x128xf32>
    %48 = tpu.matmul %46, %18, %cst_33 {dimension_numbers = #tpu.dot_dimension_numbers<[1], [0], [0], [1], [0, 0, 1, 1], [], []>} : vector<8x128xf32>, vector<128x128xf32>, vector<8x128xf32> -> vector<8x128xf32>
    %49 = arith.addf %17, %48 : vector<8x128xf32>
    %50 = math.tanh %49 : vector<8x128xf32>
    %c56 = arith.constant 56 : index
    %c0_34 = arith.constant 0 : index
    %51 = vector.load %arg11[%c56, %c0_34] : memref<352x128xf32, #tpu.memory_space<vmem>>, vector<8x128xf32>
    tpu.vector_store %arg11[%c56, %c0_34], %50 {strides = array<i32>} : memref<352x128xf32, #tpu.memory_space<vmem>>, vector<8x128xf32>,
    %cst_35 = arith.constant dense<0.000000e+00> : vector<8x128xf32>
    %52 = tpu.matmul %50, %18, %cst_35 {dimension_numbers = #tpu.dot_dimension_numbers<[1], [0], [0], [1], [0, 0, 1, 1], [], []>} : vector<8x128xf32>, vector<128x128xf32>, vector<8x128xf32> -> vector<8x128xf32>
    %53 = arith.addf %17, %52 : vector<8x128xf32>
    %54 = math.tanh %53 : vector<8x128xf32>
    %c64 = arith.constant 64 : index
    %c0_36 = arith.constant 0 : index
    %55 = vector.load %arg11[%c64, %c0_36] : memref<352x128xf32, #tpu.memory_space<vmem>>, vector<8x128xf32>
    tpu.vector_store %arg11[%c64, %c0_36], %54 {strides = array<i32>} : memref<352x128xf32, #tpu.memory_space<vmem>>, vector<8x128xf32>,
    %cst_37 = arith.constant dense<0.000000e+00> : vector<8x128xf32>
    %56 = tpu.matmul %54, %18, %cst_37 {dimension_numbers = #tpu.dot_dimension_numbers<[1], [0], [0], [1], [0, 0, 1, 1], [], []>} : vector<8x128xf32>, vector<128x128xf32>, vector<8x128xf32> -> vector<8x128xf32>
    %57 = arith.addf %17, %56 : vector<8x128xf32>
    %58 = math.tanh %57 : vector<8x128xf32>
    %c72 = arith.constant 72 : index
    %c0_38 = arith.constant 0 : index
    %59 = vector.load %arg11[%c72, %c0_38] : memref<352x128xf32, #tpu.memory_space<vmem>>, vector<8x128xf32>
    tpu.vector_store %arg11[%c72, %c0_38], %58 {strides = array<i32>} : memref<352x128xf32, #tpu.memory_space<vmem>>, vector<8x128xf32>,
    %cst_39 = arith.constant dense<0.000000e+00> : vector<8x128xf32>
    %60 = tpu.matmul %58, %18, %cst_39 {dimension_numbers = #tpu.dot_dimension_numbers<[1], [0], [0], [1], [0, 0, 1, 1], [], []>} : vector<8x128xf32>, vector<128x128xf32>, vector<8x128xf32> -> vector<8x128xf32>
    %61 = arith.addf %17, %60 : vector<8x128xf32>
    %62 = math.tanh %61 : vector<8x128xf32>
    %c80 = arith.constant 80 : index
    %c0_40 = arith.constant 0 : index
    %63 = vector.load %arg11[%c80, %c0_40] : memref<352x128xf32, #tpu.memory_space<vmem>>, vector<8x128xf32>
    tpu.vector_store %arg11[%c80, %c0_40], %62 {strides = array<i32>} : memref<352x128xf32, #tpu.memory_space<vmem>>, vector<8x128xf32>,
    %cst_41 = arith.constant dense<0.000000e+00> : vector<8x128xf32>
    %64 = tpu.matmul %62, %18, %cst_41 {dimension_numbers = #tpu.dot_dimension_numbers<[1], [0], [0], [1], [0, 0, 1, 1], [], []>} : vector<8x128xf32>, vector<128x128xf32>, vector<8x128xf32> -> vector<8x128xf32>
    %65 = arith.addf %17, %64 : vector<8x128xf32>
    %66 = math.tanh %65 : vector<8x128xf32>
    %c88 = arith.constant 88 : index
    %c0_42 = arith.constant 0 : index
    %67 = vector.load %arg11[%c88, %c0_42] : memref<352x128xf32, #tpu.memory_space<vmem>>, vector<8x128xf32>
    tpu.vector_store %arg11[%c88, %c0_42], %66 {strides = array<i32>} : memref<352x128xf32, #tpu.memory_space<vmem>>, vector<8x128xf32>,
    %cst_43 = arith.constant dense<0.000000e+00> : vector<8x128xf32>
    %68 = tpu.matmul %66, %18, %cst_43 {dimension_numbers = #tpu.dot_dimension_numbers<[1], [0], [0], [1], [0, 0, 1, 1], [], []>} : vector<8x128xf32>, vector<128x128xf32>, vector<8x128xf32> -> vector<8x128xf32>
    %69 = arith.addf %17, %68 : vector<8x128xf32>
    %70 = math.tanh %69 : vector<8x128xf32>
    %c96 = arith.constant 96 : index
    %c0_44 = arith.constant 0 : index
    %71 = vector.load %arg11[%c96, %c0_44] : memref<352x128xf32, #tpu.memory_space<vmem>>, vector<8x128xf32>
    tpu.vector_store %arg11[%c96, %c0_44], %70 {strides = array<i32>} : memref<352x128xf32, #tpu.memory_space<vmem>>, vector<8x128xf32>,
    %cst_45 = arith.constant dense<0.000000e+00> : vector<8x128xf32>
    %72 = tpu.matmul %70, %18, %cst_45 {dimension_numbers = #tpu.dot_dimension_numbers<[1], [0], [0], [1], [0, 0, 1, 1], [], []>} : vector<8x128xf32>, vector<128x128xf32>, vector<8x128xf32> -> vector<8x128xf32>
    %73 = arith.addf %17, %72 : vector<8x128xf32>
    %74 = math.tanh %73 : vector<8x128xf32>
    %c104 = arith.constant 104 : index
    %c0_46 = arith.constant 0 : index
    %75 = vector.load %arg11[%c104, %c0_46] : memref<352x128xf32, #tpu.memory_space<vmem>>, vector<8x128xf32>
    tpu.vector_store %arg11[%c104, %c0_46], %74 {strides = array<i32>} : memref<352x128xf32, #tpu.memory_space<vmem>>, vector<8x128xf32>,
    %cst_47 = arith.constant dense<0.000000e+00> : vector<8x128xf32>
    %76 = tpu.matmul %74, %18, %cst_47 {dimension_numbers = #tpu.dot_dimension_numbers<[1], [0], [0], [1], [0, 0, 1, 1], [], []>} : vector<8x128xf32>, vector<128x128xf32>, vector<8x128xf32> -> vector<8x128xf32>
    %77 = arith.addf %17, %76 : vector<8x128xf32>
    %78 = math.tanh %77 : vector<8x128xf32>
    %c112 = arith.constant 112 : index
    %c0_48 = arith.constant 0 : index
    %79 = vector.load %arg11[%c112, %c0_48] : memref<352x128xf32, #tpu.memory_space<vmem>>, vector<8x128xf32>
    tpu.vector_store %arg11[%c112, %c0_48], %78 {strides = array<i32>} : memref<352x128xf32, #tpu.memory_space<vmem>>, vector<8x128xf32>,
    %cst_49 = arith.constant dense<0.000000e+00> : vector<8x128xf32>
    %80 = tpu.matmul %78, %18, %cst_49 {dimension_numbers = #tpu.dot_dimension_numbers<[1], [0], [0], [1], [0, 0, 1, 1], [], []>} : vector<8x128xf32>, vector<128x128xf32>, vector<8x128xf32> -> vector<8x128xf32>
    %81 = arith.addf %17, %80 : vector<8x128xf32>
    %82 = math.tanh %81 : vector<8x128xf32>
    %c120 = arith.constant 120 : index
    %c0_50 = arith.constant 0 : index
    %83 = vector.load %arg11[%c120, %c0_50] : memref<352x128xf32, #tpu.memory_space<vmem>>, vector<8x128xf32>
    tpu.vector_store %arg11[%c120, %c0_50], %82 {strides = array<i32>} : memref<352x128xf32, #tpu.memory_space<vmem>>, vector<8x128xf32>,
    %cst_51 = arith.constant dense<0.000000e+00> : vector<8x128xf32>
    %84 = tpu.matmul %82, %18, %cst_51 {dimension_numbers = #tpu.dot_dimension_numbers<[1], [0], [0], [1], [0, 0, 1, 1], [], []>} : vector<8x128xf32>, vector<128x128xf32>, vector<8x128xf32> -> vector<8x128xf32>
    %85 = arith.addf %17, %84 : vector<8x128xf32>
    %86 = math.tanh %85 : vector<8x128xf32>
    %c128 = arith.constant 128 : index
    %c0_52 = arith.constant 0 : index
    %87 = vector.load %arg11[%c128, %c0_52] : memref<352x128xf32, #tpu.memory_space<vmem>>, vector<8x128xf32>
    tpu.vector_store %arg11[%c128, %c0_52], %86 {strides = array<i32>} : memref<352x128xf32, #tpu.memory_space<vmem>>, vector<8x128xf32>,
    %cst_53 = arith.constant dense<0.000000e+00> : vector<8x128xf32>
    %88 = tpu.matmul %86, %18, %cst_53 {dimension_numbers = #tpu.dot_dimension_numbers<[1], [0], [0], [1], [0, 0, 1, 1], [], []>} : vector<8x128xf32>, vector<128x128xf32>, vector<8x128xf32> -> vector<8x128xf32>
    %89 = arith.addf %17, %88 : vector<8x128xf32>
    %90 = math.tanh %89 : vector<8x128xf32>
    %c136 = arith.constant 136 : index
    %c0_54 = arith.constant 0 : index
    %91 = vector.load %arg11[%c136, %c0_54] : memref<352x128xf32, #tpu.memory_space<vmem>>, vector<8x128xf32>
    tpu.vector_store %arg11[%c136, %c0_54], %90 {strides = array<i32>} : memref<352x128xf32, #tpu.memory_space<vmem>>, vector<8x128xf32>,
    %cst_55 = arith.constant dense<0.000000e+00> : vector<8x128xf32>
    %92 = tpu.matmul %90, %18, %cst_55 {dimension_numbers = #tpu.dot_dimension_numbers<[1], [0], [0], [1], [0, 0, 1, 1], [], []>} : vector<8x128xf32>, vector<128x128xf32>, vector<8x128xf32> -> vector<8x128xf32>
    %93 = arith.addf %17, %92 : vector<8x128xf32>
    %94 = math.tanh %93 : vector<8x128xf32>
    %c144 = arith.constant 144 : index
    %c0_56 = arith.constant 0 : index
    %95 = vector.load %arg11[%c144, %c0_56] : memref<352x128xf32, #tpu.memory_space<vmem>>, vector<8x128xf32>
    tpu.vector_store %arg11[%c144, %c0_56], %94 {strides = array<i32>} : memref<352x128xf32, #tpu.memory_space<vmem>>, vector<8x128xf32>,
    %cst_57 = arith.constant dense<0.000000e+00> : vector<8x128xf32>
    %96 = tpu.matmul %94, %18, %cst_57 {dimension_numbers = #tpu.dot_dimension_numbers<[1], [0], [0], [1], [0, 0, 1, 1], [], []>} : vector<8x128xf32>, vector<128x128xf32>, vector<8x128xf32> -> vector<8x128xf32>
    %97 = arith.addf %17, %96 : vector<8x128xf32>
    %98 = math.tanh %97 : vector<8x128xf32>
    %c152 = arith.constant 152 : index
    %c0_58 = arith.constant 0 : index
    %99 = vector.load %arg11[%c152, %c0_58] : memref<352x128xf32, #tpu.memory_space<vmem>>, vector<8x128xf32>
    tpu.vector_store %arg11[%c152, %c0_58], %98 {strides = array<i32>} : memref<352x128xf32, #tpu.memory_space<vmem>>, vector<8x128xf32>,
    %cst_59 = arith.constant dense<0.000000e+00> : vector<8x128xf32>
    %100 = tpu.matmul %98, %18, %cst_59 {dimension_numbers = #tpu.dot_dimension_numbers<[1], [0], [0], [1], [0, 0, 1, 1], [], []>} : vector<8x128xf32>, vector<128x128xf32>, vector<8x128xf32> -> vector<8x128xf32>
    %101 = arith.addf %17, %100 : vector<8x128xf32>
    %102 = math.tanh %101 : vector<8x128xf32>
    %c160 = arith.constant 160 : index
    %c0_60 = arith.constant 0 : index
    %103 = vector.load %arg11[%c160, %c0_60] : memref<352x128xf32, #tpu.memory_space<vmem>>, vector<8x128xf32>
    tpu.vector_store %arg11[%c160, %c0_60], %102 {strides = array<i32>} : memref<352x128xf32, #tpu.memory_space<vmem>>, vector<8x128xf32>,
    %cst_61 = arith.constant dense<0.000000e+00> : vector<8x128xf32>
    %104 = tpu.matmul %102, %18, %cst_61 {dimension_numbers = #tpu.dot_dimension_numbers<[1], [0], [0], [1], [0, 0, 1, 1], [], []>} : vector<8x128xf32>, vector<128x128xf32>, vector<8x128xf32> -> vector<8x128xf32>
    %105 = arith.addf %17, %104 : vector<8x128xf32>
    %106 = math.tanh %105 : vector<8x128xf32>
    %c168 = arith.constant 168 : index
    %c0_62 = arith.constant 0 : index
    %107 = vector.load %arg11[%c168, %c0_62] : memref<352x128xf32, #tpu.memory_space<vmem>>, vector<8x128xf32>
    tpu.vector_store %arg11[%c168, %c0_62], %106 {strides = array<i32>} : memref<352x128xf32, #tpu.memory_space<vmem>>, vector<8x128xf32>,
    %cst_63 = arith.constant dense<0.000000e+00> : vector<8x128xf32>
    %108 = tpu.matmul %106, %18, %cst_63 {dimension_numbers = #tpu.dot_dimension_numbers<[1], [0], [0], [1], [0, 0, 1, 1], [], []>} : vector<8x128xf32>, vector<128x128xf32>, vector<8x128xf32> -> vector<8x128xf32>
    %109 = arith.addf %17, %108 : vector<8x128xf32>
    %110 = math.tanh %109 : vector<8x128xf32>
    %c176 = arith.constant 176 : index
    %c0_64 = arith.constant 0 : index
    %111 = vector.load %arg11[%c176, %c0_64] : memref<352x128xf32, #tpu.memory_space<vmem>>, vector<8x128xf32>
    tpu.vector_store %arg11[%c176, %c0_64], %110 {strides = array<i32>} : memref<352x128xf32, #tpu.memory_space<vmem>>, vector<8x128xf32>,
    %cst_65 = arith.constant dense<0.000000e+00> : vector<8x128xf32>
    %112 = tpu.matmul %110, %18, %cst_65 {dimension_numbers = #tpu.dot_dimension_numbers<[1], [0], [0], [1], [0, 0, 1, 1], [], []>} : vector<8x128xf32>, vector<128x128xf32>, vector<8x128xf32> -> vector<8x128xf32>
    %113 = arith.addf %17, %112 : vector<8x128xf32>
    %114 = math.tanh %113 : vector<8x128xf32>
    %c184 = arith.constant 184 : index
    %c0_66 = arith.constant 0 : index
    %115 = vector.load %arg11[%c184, %c0_66] : memref<352x128xf32, #tpu.memory_space<vmem>>, vector<8x128xf32>
    tpu.vector_store %arg11[%c184, %c0_66], %114 {strides = array<i32>} : memref<352x128xf32, #tpu.memory_space<vmem>>, vector<8x128xf32>,
    %cst_67 = arith.constant dense<0.000000e+00> : vector<8x128xf32>
    %116 = tpu.matmul %114, %18, %cst_67 {dimension_numbers = #tpu.dot_dimension_numbers<[1], [0], [0], [1], [0, 0, 1, 1], [], []>} : vector<8x128xf32>, vector<128x128xf32>, vector<8x128xf32> -> vector<8x128xf32>
    %117 = arith.addf %17, %116 : vector<8x128xf32>
    %118 = math.tanh %117 : vector<8x128xf32>
    %c192 = arith.constant 192 : index
    %c0_68 = arith.constant 0 : index
    %119 = vector.load %arg11[%c192, %c0_68] : memref<352x128xf32, #tpu.memory_space<vmem>>, vector<8x128xf32>
    tpu.vector_store %arg11[%c192, %c0_68], %118 {strides = array<i32>} : memref<352x128xf32, #tpu.memory_space<vmem>>, vector<8x128xf32>,
    %cst_69 = arith.constant dense<0.000000e+00> : vector<8x128xf32>
    %120 = tpu.matmul %118, %18, %cst_69 {dimension_numbers = #tpu.dot_dimension_numbers<[1], [0], [0], [1], [0, 0, 1, 1], [], []>} : vector<8x128xf32>, vector<128x128xf32>, vector<8x128xf32> -> vector<8x128xf32>
    %121 = arith.addf %17, %120 : vector<8x128xf32>
    %122 = math.tanh %121 : vector<8x128xf32>
    %c200 = arith.constant 200 : index
    %c0_70 = arith.constant 0 : index
    %123 = vector.load %arg11[%c200, %c0_70] : memref<352x128xf32, #tpu.memory_space<vmem>>, vector<8x128xf32>
    tpu.vector_store %arg11[%c200, %c0_70], %122 {strides = array<i32>} : memref<352x128xf32, #tpu.memory_space<vmem>>, vector<8x128xf32>,
    %cst_71 = arith.constant dense<0.000000e+00> : vector<8x128xf32>
    %124 = tpu.matmul %122, %18, %cst_71 {dimension_numbers = #tpu.dot_dimension_numbers<[1], [0], [0], [1], [0, 0, 1, 1], [], []>} : vector<8x128xf32>, vector<128x128xf32>, vector<8x128xf32> -> vector<8x128xf32>
    %125 = arith.addf %17, %124 : vector<8x128xf32>
    %126 = math.tanh %125 : vector<8x128xf32>
    %c208 = arith.constant 208 : index
    %c0_72 = arith.constant 0 : index
    %127 = vector.load %arg11[%c208, %c0_72] : memref<352x128xf32, #tpu.memory_space<vmem>>, vector<8x128xf32>
    tpu.vector_store %arg11[%c208, %c0_72], %126 {strides = array<i32>} : memref<352x128xf32, #tpu.memory_space<vmem>>, vector<8x128xf32>,
    %cst_73 = arith.constant dense<0.000000e+00> : vector<8x128xf32>
    %128 = tpu.matmul %126, %18, %cst_73 {dimension_numbers = #tpu.dot_dimension_numbers<[1], [0], [0], [1], [0, 0, 1, 1], [], []>} : vector<8x128xf32>, vector<128x128xf32>, vector<8x128xf32> -> vector<8x128xf32>
    %129 = arith.addf %17, %128 : vector<8x128xf32>
    %130 = math.tanh %129 : vector<8x128xf32>
    %c216 = arith.constant 216 : index
    %c0_74 = arith.constant 0 : index
    %131 = vector.load %arg11[%c216, %c0_74] : memref<352x128xf32, #tpu.memory_space<vmem>>, vector<8x128xf32>
    tpu.vector_store %arg11[%c216, %c0_74], %130 {strides = array<i32>} : memref<352x128xf32, #tpu.memory_space<vmem>>, vector<8x128xf32>,
    %cst_75 = arith.constant dense<0.000000e+00> : vector<8x128xf32>
    %132 = tpu.matmul %130, %18, %cst_75 {dimension_numbers = #tpu.dot_dimension_numbers<[1], [0], [0], [1], [0, 0, 1, 1], [], []>} : vector<8x128xf32>, vector<128x128xf32>, vector<8x128xf32> -> vector<8x128xf32>
    %133 = arith.addf %17, %132 : vector<8x128xf32>
    %134 = math.tanh %133 : vector<8x128xf32>
    %c224 = arith.constant 224 : index
    %c0_76 = arith.constant 0 : index
    %135 = vector.load %arg11[%c224, %c0_76] : memref<352x128xf32, #tpu.memory_space<vmem>>, vector<8x128xf32>
    tpu.vector_store %arg11[%c224, %c0_76], %134 {strides = array<i32>} : memref<352x128xf32, #tpu.memory_space<vmem>>, vector<8x128xf32>,
    %cst_77 = arith.constant dense<0.000000e+00> : vector<8x128xf32>
    %136 = tpu.matmul %134, %18, %cst_77 {dimension_numbers = #tpu.dot_dimension_numbers<[1], [0], [0], [1], [0, 0, 1, 1], [], []>} : vector<8x128xf32>, vector<128x128xf32>, vector<8x128xf32> -> vector<8x128xf32>
    %137 = arith.addf %17, %136 : vector<8x128xf32>
    %138 = math.tanh %137 : vector<8x128xf32>
    %c232 = arith.constant 232 : index
    %c0_78 = arith.constant 0 : index
    %139 = vector.load %arg11[%c232, %c0_78] : memref<352x128xf32, #tpu.memory_space<vmem>>, vector<8x128xf32>
    tpu.vector_store %arg11[%c232, %c0_78], %138 {strides = array<i32>} : memref<352x128xf32, #tpu.memory_space<vmem>>, vector<8x128xf32>,
    %cst_79 = arith.constant dense<0.000000e+00> : vector<8x128xf32>
    %140 = tpu.matmul %138, %18, %cst_79 {dimension_numbers = #tpu.dot_dimension_numbers<[1], [0], [0], [1], [0, 0, 1, 1], [], []>} : vector<8x128xf32>, vector<128x128xf32>, vector<8x128xf32> -> vector<8x128xf32>
    %141 = arith.addf %17, %140 : vector<8x128xf32>
    %142 = math.tanh %141 : vector<8x128xf32>
    %c240 = arith.constant 240 : index
    %c0_80 = arith.constant 0 : index
    %143 = vector.load %arg11[%c240, %c0_80] : memref<352x128xf32, #tpu.memory_space<vmem>>, vector<8x128xf32>
    tpu.vector_store %arg11[%c240, %c0_80], %142 {strides = array<i32>} : memref<352x128xf32, #tpu.memory_space<vmem>>, vector<8x128xf32>,
    %cst_81 = arith.constant dense<0.000000e+00> : vector<8x128xf32>
    %144 = tpu.matmul %142, %18, %cst_81 {dimension_numbers = #tpu.dot_dimension_numbers<[1], [0], [0], [1], [0, 0, 1, 1], [], []>} : vector<8x128xf32>, vector<128x128xf32>, vector<8x128xf32> -> vector<8x128xf32>
    %145 = arith.addf %17, %144 : vector<8x128xf32>
    %146 = math.tanh %145 : vector<8x128xf32>
    %c248 = arith.constant 248 : index
    %c0_82 = arith.constant 0 : index
    %147 = vector.load %arg11[%c248, %c0_82] : memref<352x128xf32, #tpu.memory_space<vmem>>, vector<8x128xf32>
    tpu.vector_store %arg11[%c248, %c0_82], %146 {strides = array<i32>} : memref<352x128xf32, #tpu.memory_space<vmem>>, vector<8x128xf32>,
    %cst_83 = arith.constant dense<0.000000e+00> : vector<8x128xf32>
    %148 = tpu.matmul %146, %18, %cst_83 {dimension_numbers = #tpu.dot_dimension_numbers<[1], [0], [0], [1], [0, 0, 1, 1], [], []>} : vector<8x128xf32>, vector<128x128xf32>, vector<8x128xf32> -> vector<8x128xf32>
    %149 = arith.addf %17, %148 : vector<8x128xf32>
    %150 = math.tanh %149 : vector<8x128xf32>
    %c256 = arith.constant 256 : index
    %c0_84 = arith.constant 0 : index
    %151 = vector.load %arg11[%c256, %c0_84] : memref<352x128xf32, #tpu.memory_space<vmem>>, vector<8x128xf32>
    tpu.vector_store %arg11[%c256, %c0_84], %150 {strides = array<i32>} : memref<352x128xf32, #tpu.memory_space<vmem>>, vector<8x128xf32>,
    %cst_85 = arith.constant dense<0.000000e+00> : vector<8x128xf32>
    %152 = tpu.matmul %150, %18, %cst_85 {dimension_numbers = #tpu.dot_dimension_numbers<[1], [0], [0], [1], [0, 0, 1, 1], [], []>} : vector<8x128xf32>, vector<128x128xf32>, vector<8x128xf32> -> vector<8x128xf32>
    %153 = arith.addf %17, %152 : vector<8x128xf32>
    %154 = math.tanh %153 : vector<8x128xf32>
    %c264 = arith.constant 264 : index
    %c0_86 = arith.constant 0 : index
    %155 = vector.load %arg11[%c264, %c0_86] : memref<352x128xf32, #tpu.memory_space<vmem>>, vector<8x128xf32>
    tpu.vector_store %arg11[%c264, %c0_86], %154 {strides = array<i32>} : memref<352x128xf32, #tpu.memory_space<vmem>>, vector<8x128xf32>,
    %cst_87 = arith.constant dense<0.000000e+00> : vector<8x128xf32>
    %156 = tpu.matmul %154, %18, %cst_87 {dimension_numbers = #tpu.dot_dimension_numbers<[1], [0], [0], [1], [0, 0, 1, 1], [], []>} : vector<8x128xf32>, vector<128x128xf32>, vector<8x128xf32> -> vector<8x128xf32>
    %157 = arith.addf %17, %156 : vector<8x128xf32>
    %158 = math.tanh %157 : vector<8x128xf32>
    %c272 = arith.constant 272 : index
    %c0_88 = arith.constant 0 : index
    %159 = vector.load %arg11[%c272, %c0_88] : memref<352x128xf32, #tpu.memory_space<vmem>>, vector<8x128xf32>
    tpu.vector_store %arg11[%c272, %c0_88], %158 {strides = array<i32>} : memref<352x128xf32, #tpu.memory_space<vmem>>, vector<8x128xf32>,
    %cst_89 = arith.constant dense<0.000000e+00> : vector<8x128xf32>
    %160 = tpu.matmul %158, %18, %cst_89 {dimension_numbers = #tpu.dot_dimension_numbers<[1], [0], [0], [1], [0, 0, 1, 1], [], []>} : vector<8x128xf32>, vector<128x128xf32>, vector<8x128xf32> -> vector<8x128xf32>
    %161 = arith.addf %17, %160 : vector<8x128xf32>
    %162 = math.tanh %161 : vector<8x128xf32>
    %c280 = arith.constant 280 : index
    %c0_90 = arith.constant 0 : index
    %163 = vector.load %arg11[%c280, %c0_90] : memref<352x128xf32, #tpu.memory_space<vmem>>, vector<8x128xf32>
    tpu.vector_store %arg11[%c280, %c0_90], %162 {strides = array<i32>} : memref<352x128xf32, #tpu.memory_space<vmem>>, vector<8x128xf32>,
    %cst_91 = arith.constant dense<0.000000e+00> : vector<8x128xf32>
    %164 = tpu.matmul %162, %18, %cst_91 {dimension_numbers = #tpu.dot_dimension_numbers<[1], [0], [0], [1], [0, 0, 1, 1], [], []>} : vector<8x128xf32>, vector<128x128xf32>, vector<8x128xf32> -> vector<8x128xf32>
    %165 = arith.addf %17, %164 : vector<8x128xf32>
    %166 = math.tanh %165 : vector<8x128xf32>
    %c288 = arith.constant 288 : index
    %c0_92 = arith.constant 0 : index
    %167 = vector.load %arg11[%c288, %c0_92] : memref<352x128xf32, #tpu.memory_space<vmem>>, vector<8x128xf32>
    tpu.vector_store %arg11[%c288, %c0_92], %166 {strides = array<i32>} : memref<352x128xf32, #tpu.memory_space<vmem>>, vector<8x128xf32>,
    %cst_93 = arith.constant dense<0.000000e+00> : vector<8x128xf32>
    %168 = tpu.matmul %166, %18, %cst_93 {dimension_numbers = #tpu.dot_dimension_numbers<[1], [0], [0], [1], [0, 0, 1, 1], [], []>} : vector<8x128xf32>, vector<128x128xf32>, vector<8x128xf32> -> vector<8x128xf32>
    %169 = arith.addf %17, %168 : vector<8x128xf32>
    %170 = math.tanh %169 : vector<8x128xf32>
    %c296 = arith.constant 296 : index
    %c0_94 = arith.constant 0 : index
    %171 = vector.load %arg11[%c296, %c0_94] : memref<352x128xf32, #tpu.memory_space<vmem>>, vector<8x128xf32>
    tpu.vector_store %arg11[%c296, %c0_94], %170 {strides = array<i32>} : memref<352x128xf32, #tpu.memory_space<vmem>>, vector<8x128xf32>,
    %cst_95 = arith.constant dense<0.000000e+00> : vector<8x128xf32>
    %172 = tpu.matmul %170, %18, %cst_95 {dimension_numbers = #tpu.dot_dimension_numbers<[1], [0], [0], [1], [0, 0, 1, 1], [], []>} : vector<8x128xf32>, vector<128x128xf32>, vector<8x128xf32> -> vector<8x128xf32>
    %173 = arith.addf %17, %172 : vector<8x128xf32>
    %174 = math.tanh %173 : vector<8x128xf32>
    %c304 = arith.constant 304 : index
    %c0_96 = arith.constant 0 : index
    %175 = vector.load %arg11[%c304, %c0_96] : memref<352x128xf32, #tpu.memory_space<vmem>>, vector<8x128xf32>
    tpu.vector_store %arg11[%c304, %c0_96], %174 {strides = array<i32>} : memref<352x128xf32, #tpu.memory_space<vmem>>, vector<8x128xf32>,
    %cst_97 = arith.constant dense<0.000000e+00> : vector<8x128xf32>
    %176 = tpu.matmul %174, %18, %cst_97 {dimension_numbers = #tpu.dot_dimension_numbers<[1], [0], [0], [1], [0, 0, 1, 1], [], []>} : vector<8x128xf32>, vector<128x128xf32>, vector<8x128xf32> -> vector<8x128xf32>
    %177 = arith.addf %17, %176 : vector<8x128xf32>
    %178 = math.tanh %177 : vector<8x128xf32>
    %c312 = arith.constant 312 : index
    %c0_98 = arith.constant 0 : index
    %179 = vector.load %arg11[%c312, %c0_98] : memref<352x128xf32, #tpu.memory_space<vmem>>, vector<8x128xf32>
    tpu.vector_store %arg11[%c312, %c0_98], %178 {strides = array<i32>} : memref<352x128xf32, #tpu.memory_space<vmem>>, vector<8x128xf32>,
    %cst_99 = arith.constant dense<0.000000e+00> : vector<8x128xf32>
    %180 = tpu.matmul %178, %18, %cst_99 {dimension_numbers = #tpu.dot_dimension_numbers<[1], [0], [0], [1], [0, 0, 1, 1], [], []>} : vector<8x128xf32>, vector<128x128xf32>, vector<8x128xf32> -> vector<8x128xf32>
    %181 = arith.addf %17, %180 : vector<8x128xf32>
    %182 = math.tanh %181 : vector<8x128xf32>
    %c320 = arith.constant 320 : index
    %c0_100 = arith.constant 0 : index
    %183 = vector.load %arg11[%c320, %c0_100] : memref<352x128xf32, #tpu.memory_space<vmem>>, vector<8x128xf32>
    tpu.vector_store %arg11[%c320, %c0_100], %182 {strides = array<i32>} : memref<352x128xf32, #tpu.memory_space<vmem>>, vector<8x128xf32>,
    %cst_101 = arith.constant dense<0.000000e+00> : vector<8x128xf32>
    %184 = tpu.matmul %182, %18, %cst_101 {dimension_numbers = #tpu.dot_dimension_numbers<[1], [0], [0], [1], [0, 0, 1, 1], [], []>} : vector<8x128xf32>, vector<128x128xf32>, vector<8x128xf32> -> vector<8x128xf32>
    %185 = arith.addf %17, %184 : vector<8x128xf32>
    %186 = math.tanh %185 : vector<8x128xf32>
    %c328 = arith.constant 328 : index
    %c0_102 = arith.constant 0 : index
    %187 = vector.load %arg11[%c328, %c0_102] : memref<352x128xf32, #tpu.memory_space<vmem>>, vector<8x128xf32>
    tpu.vector_store %arg11[%c328, %c0_102], %186 {strides = array<i32>} : memref<352x128xf32, #tpu.memory_space<vmem>>, vector<8x128xf32>,
    %cst_103 = arith.constant dense<0.000000e+00> : vector<8x128xf32>
    %188 = tpu.matmul %186, %18, %cst_103 {dimension_numbers = #tpu.dot_dimension_numbers<[1], [0], [0], [1], [0, 0, 1, 1], [], []>} : vector<8x128xf32>, vector<128x128xf32>, vector<8x128xf32> -> vector<8x128xf32>
    %189 = arith.addf %17, %188 : vector<8x128xf32>
    %190 = math.tanh %189 : vector<8x128xf32>
    %c336 = arith.constant 336 : index
    %c0_104 = arith.constant 0 : index
    %191 = vector.load %arg11[%c336, %c0_104] : memref<352x128xf32, #tpu.memory_space<vmem>>, vector<8x128xf32>
    tpu.vector_store %arg11[%c336, %c0_104], %190 {strides = array<i32>} : memref<352x128xf32, #tpu.memory_space<vmem>>, vector<8x128xf32>,
    %cst_105 = arith.constant dense<0.000000e+00> : vector<8x128xf32>
    %192 = tpu.matmul %190, %18, %cst_105 {dimension_numbers = #tpu.dot_dimension_numbers<[1], [0], [0], [1], [0, 0, 1, 1], [], []>} : vector<8x128xf32>, vector<128x128xf32>, vector<8x128xf32> -> vector<8x128xf32>
    %193 = arith.addf %17, %192 : vector<8x128xf32>
    %194 = math.tanh %193 : vector<8x128xf32>
    %c344 = arith.constant 344 : index
    %c0_106 = arith.constant 0 : index
    %195 = vector.load %arg11[%c344, %c0_106] : memref<352x128xf32, #tpu.memory_space<vmem>>, vector<8x128xf32>
    tpu.vector_store %arg11[%c344, %c0_106], %194 {strides = array<i32>} : memref<352x128xf32, #tpu.memory_space<vmem>>, vector<8x128xf32>,
    %c0_107 = arith.constant 0 : index
    %c0_108 = arith.constant 0 : index
    %196 = vector.load %arg11[%c0_107, %c0_108] : memref<352x128xf32, #tpu.memory_space<vmem>>, vector<352x128xf32>
    %c0_109 = arith.constant 0 : index
    %c0_110 = arith.constant 0 : index
    %197 = vector.load %arg8[%c0_109, %c0_110] : memref<128x132xf32, #tpu.memory_space<vmem>>, vector<128x132xf32>
    %cst_111 = arith.constant dense<0.000000e+00> : vector<352x132xf32>
    %198 = tpu.matmul %196, %197, %cst_111 {dimension_numbers = #tpu.dot_dimension_numbers<[1], [0], [0], [1], [0, 0, 1, 1], [], []>} : vector<352x128xf32>, vector<128x132xf32>, vector<352x132xf32> -> vector<352x132xf32>
    %c0_112 = arith.constant 0 : index
    %c0_113 = arith.constant 0 : index
    %199 = vector.load %arg9[%c0_112, %c0_113] : memref<1x132xf32, #tpu.memory_space<vmem>>, vector<1x132xf32>
    %200 = vector.broadcast %199 : vector<1x132xf32> to vector<352x132xf32>
    %201 = arith.addf %198, %200 : vector<352x132xf32>
    %c0_114 = arith.constant 0 : index
    %c0_115 = arith.constant 0 : index
    %202 = vector.load %arg10[%c0_114, %c0_115] : memref<352x132xf32, #tpu.memory_space<vmem>>, vector<352x132xf32>
    tpu.vector_store %arg10[%c0_114, %c0_115], %201 {strides = array<i32>} : memref<352x132xf32, #tpu.memory_space<vmem>>, vector<352x132xf32>,
    return
  }
}

</mosaic_0001>

<bundles_post_ra>
// kernel: _policy_forward_impl.1
= control target key start
LH: loop header
LB: loop body
LE: loop exit
PB: predicated region body
PF: predicated region fallthrough
CT: control target
= control target key end

     0   :  { %vm50_vm0 = vcmask 1043456   ;;  %vm46_vm1 = vcmask 359424   ;;  %vm87_vm2 = vcmask 523264   ;;  %v1800_v51 = vmov 0.0   ;;  %s3581_s1 = inlined_call_operand.vmem [shape: f32[44,64], index: 1, kind: input, shape index: {}]   ;;  %s3582_s3 = inlined_call_operand.vmem [shape: f32[64,128], index: 3, kind: input, shape index: {}]   ;;  %s3583_s2 = inlined_call_operand.vmem [shape: f32[1,64], index: 2, kind: input, shape index: {}]   ;;  %s3584_s0 = inlined_call_operand.vmem [shape: f32[8,44], index: 0, kind: input, shape index: {}]   ;;  %s3585_s4 = inlined_call_operand.vmem [shape: f32[1,128], index: 4, kind: input, shape index: {}]   ;;  %s3586_s5 = inlined_call_operand.vmem [shape: f32[128,128], index: 5, kind: input, shape index: {}]   ;;  %s3587_s7 = inlined_call_operand.vmem [shape: f32[128,128], index: 7, kind: input, shape index: {}]   ;;  %s3588_s6 = inlined_call_operand.vmem [shape: f32[1,128], index: 6, kind: input, shape index: {}]   ;;  %s3589_s8 = inlined_call_operand.vmem [shape: f32[128,132], index: 8, kind: input, shape index: {}]   ;;  %s3590_s9 = inlined_call_operand.vmem [shape: f32[1,132], index: 9, kind: input, shape index: {}]   ;;  %s3591_s10 = inlined_call_operand.vmem [shape: f32[352,132], index: 10, kind: output, shape index: {}]  }
   0x1   :  { %v41_v0 = vld [vmem:[%s3581_s1 + $0x28] sm:$0xf]  ;;  %v40_v1 = vld [vmem:[%s3581_s1 + $0x20] sm:$0xff]  ;;  %v39_v2 = vld [vmem:[%s3581_s1 + $0x18] sm:$0xff]  ;;  %vm1561_vm3 = vcmask 31744  }
   0x2   :  { %1653 = vmatpush.msk.msra.mxu0 %vm50_vm0, %v41_v0  ;;  %v82_v3 = vld [vmem:[%s3582_s3 + $0x38] sm:$0xff]  ;;  %v81_v4 = vld [vmem:[%s3582_s3 + $0x30] sm:$0xff]  ;;  %v80_v6 = vld [vmem:[%s3582_s3 + $0x28] sm:$0xff] }
   0x3   :  { %99 = vmatpush.msra.mxu1 %v82_v3  ;;  %v38_v5 = vld [vmem:[%s3581_s1 + $0x10] sm:$0xff]  ;;  %v37_v7 = vld [vmem:[%s3581_s1 + $0x8] sm:$0xff]  ;;  %v36_v8 = vld [vmem:[%s3581_s1] sm:$0xff] }
   0x4   :  { %65 = vmatpush.msra.mxu0 %v40_v1  ;;  %v35_v9 = vld [vmem:[%s3584_s0] sm:$0xff]  ;;  %v78_v11 = vld [vmem:[%s3582_s3 + $0x18] sm:$0xff]  ;;  %v77_v12 = vld [vmem:[%s3582_s3 + $0x10] sm:$0xff] }
   0x5   :  { %100 = vmatpush.msra.mxu1 %v81_v4  ;;  %v79_v10 = vld [vmem:[%s3582_s3 + $0x20] sm:$0xff]  ;;  %v76_v13 = vld [vmem:[%s3582_s3 + $0x8] sm:$0xff]  ;;  %v127_v15 = vld [vmem:[%s3586_s5 + $0x78] sm:$0xff] }
   0x6   :  { %66 = vmatpush.msra.mxu0 %v39_v2  ;;  %v75_v14 = vld [vmem:[%s3582_s3] sm:$0xff]  ;;  %v126_v16 = vld [vmem:[%s3586_s5 + $0x70] sm:$0xff]  ;;  %v1910_v17 = vld [vmem:[%s3587_s7 + $0x78] sm:$0xff]  ;;  %132 = vmatpush.msra.mxu2 %v127_v15 }
   0x7   :  { %101 = vmatpush.msra.mxu1 %v80_v6  ;;  %168 = vmatpush.msra.mxu3 %v1910_v17  ;;  %v1916_v18 = vld [vmem:[%s3587_s7 + $0x70] sm:$0xff]  ;;  %v125_v19 = vld [vmem:[%s3586_s5 + $0x68] sm:$0xff]  ;;  %v124_v21 = vld [vmem:[%s3586_s5 + $0x60] sm:$0xff] }
   0x8   :  { %67 = vmatpush.msra.mxu0 %v38_v5  ;;  %v1924_v20 = vld [vmem:[%s3587_s7 + $0x68] sm:$0xff]  ;;  %133 = vmatpush.msra.mxu2 %v126_v16  ;;  %v1935_v22 = vld [vmem:[%s3587_s7 + $0x60] sm:$0xff]  ;;  %v123_v23 = vld [vmem:[%s3586_s5 + $0x58] sm:$0xff] }
   0x9   :  { %102 = vmatpush.msra.mxu1 %v79_v10  ;;  %169 = vmatpush.msra.mxu3 %v1916_v18  ;;  %v1946_v24 = vld [vmem:[%s3587_s7 + $0x58] sm:$0xff]  ;;  %v122_v25 = vld [vmem:[%s3586_s5 + $0x50] sm:$0xff]  ;;  %v121_v27 = vld [vmem:[%s3586_s5 + $0x48] sm:$0xff] }
   0xa   :  { %68 = vmatpush.msra.mxu0 %v37_v7  ;;  %134 = vmatpush.msra.mxu2 %v125_v19  ;;  %v1957_v26 = vld [vmem:[%s3587_s7 + $0x50] sm:$0xff]  ;;  %v1968_v28 = vld [vmem:[%s3587_s7 + $0x48] sm:$0xff]  ;;  %v120_v29 = vld [vmem:[%s3586_s5 + $0x40] sm:$0xff] }
   0xb   :  { %103 = vmatpush.msra.mxu1 %v78_v11  ;;  %170 = vmatpush.msra.mxu3 %v1924_v20  ;;  %v1979_v30 = vld [vmem:[%s3587_s7 + $0x40] sm:$0xff]  ;;  %v119_v31 = vld [vmem:[%s3586_s5 + $0x38] sm:$0xff]  ;;  %v118_v33 = vld [vmem:[%s3586_s5 + $0x30] sm:$0xff] }
   0xc   :  { %69 = vmatpush.msra.mxu0 %v36_v8  ;;  %135 = vmatpush.msra.mxu2 %v124_v21  ;;  %v1990_v32 = vld [vmem:[%s3587_s7 + $0x38] sm:$0xff]  ;;  %v2001_v34 = vld [vmem:[%s3587_s7 + $0x30] sm:$0xff]  ;;  %v117_v35 = vld [vmem:[%s3586_s5 + $0x28] sm:$0xff] }
   0xd   :  { %1654 = vmatmul.msk.f32.vlgmr.msra.gmra.mxu0 %vm46_vm1, %v35_v9  ;;  %104 = vmatpush.msra.mxu1 %v77_v12  ;;  %v1689_v36 = vld [vmem:[%s3583_s2] ss:$0 sm:$0xff]  ;;  %v2023_v41 = vld [vmem:[%s3587_s7 + $0x28] sm:$0xff]  ;;  %v115_v42 = vld [vmem:[%s3586_s5 + $0x18] sm:$0xff] }
   0xe   :  { %191 = vmatpush.msrb.mxu0 %v1910_v17  ;;  %171 = vmatpush.msra.mxu3 %v1935_v22  ;;  %v116_v40 = vld [vmem:[%s3586_s5 + $0x20] sm:$0xff]  ;;  %v114_v44 = vld [vmem:[%s3586_s5 + $0x10] sm:$0xff]  ;;  %v2043_v45 = vld [vmem:[%s3587_s7 + $0x18] sm:$0xff] }
   0xf   :  { %105 = vmatpush.msra.mxu1 %v76_v13  ;;  %136 = vmatpush.msra.mxu2 %v123_v23  ;;  %v2032_v43 = vld [vmem:[%s3587_s7 + $0x20] sm:$0xff]  ;;  %v113_v46 = vld [vmem:[%s3586_s5 + $0x8] sm:$0xff]  ;;  %v2051_v47 = vld [vmem:[%s3587_s7 + $0x10] sm:$0xff] }
  0x10   :  { %192 = vmatpush.msrb.mxu0 %v1916_v18  ;;  %172 = vmatpush.msra.mxu3 %v1946_v24  ;;  %v112_v48 = vld [vmem:[%s3586_s5] sm:$0xff]  ;;  %v2062_v49 = vld [vmem:[%s3587_s7 + $0x8] sm:$0xff] }
  0x11   :  { %106 = vmatpush.msra.mxu1 %v75_v14  ;;  %137 = vmatpush.msra.mxu2 %v122_v25  ;;  %v2073_v50 = vld [vmem:[%s3587_s7] sm:$0xff] }
  0x12   :  { %193 = vmatpush.msrb.mxu0 %v1924_v20  ;;  %173 = vmatpush.msra.mxu3 %v1957_v26  ;;  %v1690_v52 = vld [vmem:[%s3585_s4] ss:$0 sm:$0xff] }
  0x13   :  { %214 = vmatpush.msrb.mxu1 %v1910_v17  ;;  %138 = vmatpush.msra.mxu2 %v121_v27  ;;  %v1691_v56 = vld [vmem:[%s3588_s6] ss:$0 sm:$0xff] }
  0x14   :  { %194 = vmatpush.msrb.mxu0 %v1935_v22  ;;  %174 = vmatpush.msra.mxu3 %v1968_v28 }
  0x15   :  { %215 = vmatpush.msrb.mxu1 %v1916_v18  ;;  %139 = vmatpush.msra.mxu2 %v120_v29 }
  0x16   :  { %195 = vmatpush.msrb.mxu0 %v1946_v24  ;;  %175 = vmatpush.msra.mxu3 %v1979_v30 }
  0x17   :  { %216 = vmatpush.msrb.mxu1 %v1924_v20  ;;  %140 = vmatpush.msra.mxu2 %v119_v31 }
  0x18   :  { %196 = vmatpush.msrb.mxu0 %v1957_v26  ;;  %176 = vmatpush.msra.mxu3 %v1990_v32 }
  0x19   :  { %217 = vmatpush.msrb.mxu1 %v1935_v22  ;;  %141 = vmatpush.msra.mxu2 %v118_v33 }
  0x1a   :  { %197 = vmatpush.msrb.mxu0 %v1968_v28  ;;  %177 = vmatpush.msra.mxu3 %v2001_v34 }
  0x1b   :  { %218 = vmatpush.msrb.mxu1 %v1946_v24  ;;  %142 = vmatpush.msra.mxu2 %v117_v35 }
  0x1c   :  { %198 = vmatpush.msrb.mxu0 %v1979_v30  ;;  %178 = vmatpush.msra.mxu3 %v2023_v41 }
  0x1d   :  { %219 = vmatpush.msrb.mxu1 %v1957_v26  ;;  %143 = vmatpush.msra.mxu2 %v116_v40 }
  0x1e   :  { %199 = vmatpush.msrb.mxu0 %v1990_v32  ;;  %179 = vmatpush.msra.mxu3 %v2032_v43 }
  0x1f   :  { %220 = vmatpush.msrb.mxu1 %v1968_v28  ;;  %144 = vmatpush.msra.mxu2 %v115_v42 }
  0x20   :  { %200 = vmatpush.msrb.mxu0 %v2001_v34  ;;  %180 = vmatpush.msra.mxu3 %v2043_v45 }
  0x21   :  { %221 = vmatpush.msrb.mxu1 %v1979_v30  ;;  %145 = vmatpush.msra.mxu2 %v114_v44 }
  0x22   :  { %201 = vmatpush.msrb.mxu0 %v2023_v41  ;;  %181 = vmatpush.msra.mxu3 %v2051_v47 }
  0x23   :  { %222 = vmatpush.msrb.mxu1 %v1990_v32  ;;  %146 = vmatpush.msra.mxu2 %v113_v46 }
  0x24   :  { %202 = vmatpush.msrb.mxu0 %v2032_v43  ;;  %182 = vmatpush.msra.mxu3 %v2062_v49 }
  0x25   :  { %223 = vmatpush.msrb.mxu1 %v2001_v34  ;;  %147 = vmatpush.msra.mxu2 %v112_v48 }
  0x26   :  { %203 = vmatpush.msrb.mxu0 %v2043_v45  ;;  %183 = vmatpush.msra.mxu3 %v2073_v50 }
  0x27   :  { %224 = vmatpush.msrb.mxu1 %v2023_v41  ;;  %237 = vmatpush.msrb.mxu2 %v1910_v17 }
  0x28   :  { %204 = vmatpush.msrb.mxu0 %v2051_v47  ;;  %184 = vmatmul.f32.vlgmr.msra.gmra.mxu3 %v1800_v51 }
  0x29   :  { %225 = vmatpush.msrb.mxu1 %v2032_v43  ;;  %238 = vmatpush.msrb.mxu2 %v1916_v18 }
  0x2a   :  { %205 = vmatpush.msrb.mxu0 %v2062_v49  ;;  %260 = vmatpush.msrb.mxu3 %v1910_v17 }
  0x2b   :  { %226 = vmatpush.msrb.mxu1 %v2043_v45  ;;  %239 = vmatpush.msrb.mxu2 %v1924_v20 }
  0x2c   :  { %206 = vmatpush.msrb.mxu0 %v2073_v50  ;;  %261 = vmatpush.msrb.mxu3 %v1916_v18 }
  0x2d   :  { %227 = vmatpush.msrb.mxu1 %v2051_v47  ;;  %240 = vmatpush.msrb.mxu2 %v1935_v22 }
  0x2e   :  { %283 = vmatpush.msra.mxu0 %v1910_v17  ;;  %262 = vmatpush.msrb.mxu3 %v1924_v20 }
  0x2f   :  { %228 = vmatpush.msrb.mxu1 %v2062_v49  ;;  %241 = vmatpush.msrb.mxu2 %v1946_v24 }
  0x30   :  { %284 = vmatpush.msra.mxu0 %v1916_v18  ;;  %263 = vmatpush.msrb.mxu3 %v1935_v22 }
  0x31   :  { %229 = vmatpush.msrb.mxu1 %v2073_v50  ;;  %242 = vmatpush.msrb.mxu2 %v1957_v26 }
  0x32   :  { %285 = vmatpush.msra.mxu0 %v1924_v20  ;;  %264 = vmatpush.msrb.mxu3 %v1946_v24 }
  0x33   :  { %243 = vmatpush.msrb.mxu2 %v1968_v28 }
  0x34   :  { %286 = vmatpush.msra.mxu0 %v1935_v22  ;;  %265 = vmatpush.msrb.mxu3 %v1957_v26 }
  0x35   :  { %244 = vmatpush.msrb.mxu2 %v1979_v30 }
  0x36   :  { %287 = vmatpush.msra.mxu0 %v1946_v24  ;;  %266 = vmatpush.msrb.mxu3 %v1968_v28 }
  0x37   :  { %245 = vmatpush.msrb.mxu2 %v1990_v32 }
  0x38   :  { %288 = vmatpush.msra.mxu0 %v1957_v26  ;;  %267 = vmatpush.msrb.mxu3 %v1979_v30 }
  0x39   :  { %246 = vmatpush.msrb.mxu2 %v2001_v34 }
  0x3a   :  { %289 = vmatpush.msra.mxu0 %v1968_v28  ;;  %268 = vmatpush.msrb.mxu3 %v1990_v32 }
  0x3b   :  { %247 = vmatpush.msrb.mxu2 %v2023_v41 }
  0x3c   :  { %290 = vmatpush.msra.mxu0 %v1979_v30  ;;  %269 = vmatpush.msrb.mxu3 %v2001_v34 }
  0x3d   :  { %248 = vmatpush.msrb.mxu2 %v2032_v43 }
  0x3e   :  { %291 = vmatpush.msra.mxu0 %v1990_v32  ;;  %270 = vmatpush.msrb.mxu3 %v2023_v41 }
  0x3f   :  { %249 = vmatpush.msrb.mxu2 %v2043_v45 }
  0x40   :  { %292 = vmatpush.msra.mxu0 %v2001_v34  ;;  %271 = vmatpush.msrb.mxu3 %v2032_v43 }
  0x41   :  { %250 = vmatpush.msrb.mxu2 %v2051_v47 }
  0x42   :  { %293 = vmatpush.msra.mxu0 %v2023_v41  ;;  %272 = vmatpush.msrb.mxu3 %v2043_v45 }
  0x43   :  { %251 = vmatpush.msrb.mxu2 %v2062_v49 }
  0x44   :  { %294 = vmatpush.msra.mxu0 %v2032_v43  ;;  %273 = vmatpush.msrb.mxu3 %v2051_v47 }
  0x45   :  { %252 = vmatpush.msrb.mxu2 %v2073_v50 }
  0x46   :  { %295 = vmatpush.msra.mxu0 %v2043_v45  ;;  %274 = vmatpush.msrb.mxu3 %v2062_v49 }
  0x48   :  { %296 = vmatpush.msra.mxu0 %v2051_v47  ;;  %275 = vmatpush.msrb.mxu3 %v2073_v50 }
  0x4a   :  { %297 = vmatpush.msra.mxu0 %v2062_v49  ;;  %352 = vmatpush.msra.mxu3 %v1910_v17 }
  0x4c   :  { %298 = vmatpush.msra.mxu0 %v2073_v50  ;;  %353 = vmatpush.msra.mxu3 %v1916_v18 }
  0x4e   :  { %354 = vmatpush.msra.mxu3 %v1924_v20 }
  0x50   :  { %355 = vmatpush.msra.mxu3 %v1935_v22 }
  0x52   :  { %356 = vmatpush.msra.mxu3 %v1946_v24 }
  0x54   :  { %357 = vmatpush.msra.mxu3 %v1957_v26 }
  0x56   :  { %358 = vmatpush.msra.mxu3 %v1968_v28 }
  0x58   :  { %359 = vmatpush.msra.mxu3 %v1979_v30 }
  0x5a   :  { %360 = vmatpush.msra.mxu3 %v1990_v32 }
  0x5c   :  { %361 = vmatpush.msra.mxu3 %v2001_v34 }
  0x5e   :  { %362 = vmatpush.msra.mxu3 %v2023_v41 }
  0x60   :  { %363 = vmatpush.msra.mxu3 %v2032_v43 }
  0x62   :  { %364 = vmatpush.msra.mxu3 %v2043_v45 }
  0x64   :  { %365 = vmatpush.msra.mxu3 %v2051_v47 }
  0x66   :  { %366 = vmatpush.msra.mxu3 %v2062_v49 }
  0x68   :  { %367 = vmatpush.msra.mxu3 %v2073_v50 }
  0x8a   :  { %v71_v37 = vpop.f32.mrf.mxu0 }
  0x8b   :  { %v72_v38 = vadd.f32 %v1689_v36, %v71_v37 }
  0x8d   :  { %1692 = vtanh.f32 %v72_v38 }
  0x93   :  { %v1693_v39 = vpop.eup %1692 }
  0x94   :  { %1655 = vmatmul.msk.f32.vlgmr.msra.gmra.mxu1 %vm87_vm2, %v1693_v39 }
  0x95   :  { %306 = vmatpush.msra.mxu1 %v1910_v17 }
  0x97   :  { %307 = vmatpush.msra.mxu1 %v1916_v18 }
  0x99   :  { %308 = vmatpush.msra.mxu1 %v1924_v20 }
  0x9b   :  { %309 = vmatpush.msra.mxu1 %v1935_v22 }
  0x9d   :  { %310 = vmatpush.msra.mxu1 %v1946_v24 }
  0x9f   :  { %311 = vmatpush.msra.mxu1 %v1957_v26 }
  0xa1   :  { %312 = vmatpush.msra.mxu1 %v1968_v28 }
  0xa3   :  { %313 = vmatpush.msra.mxu1 %v1979_v30 }
  0xa5   :  { %314 = vmatpush.msra.mxu1 %v1990_v32 }
  0xa7   :  { %315 = vmatpush.msra.mxu1 %v2001_v34 }
  0xa9   :  { %316 = vmatpush.msra.mxu1 %v2023_v41 }
  0xab   :  { %317 = vmatpush.msra.mxu1 %v2032_v43  ;;  %v185_v58 = vpop.f32.mrf.mxu3 }
  0xad   :  { %318 = vmatpush.msra.mxu1 %v2043_v45 }
  0xaf   :  { %319 = vmatpush.msra.mxu1 %v2051_v47 }
  0xb1   :  { %320 = vmatpush.msra.mxu1 %v2062_v49 }
  0xb3   :  { %321 = vmatpush.msra.mxu1 %v2073_v50 }
 0x111   :  { %v108_v53 = vpop.f32.mrf.mxu1 }
 0x112   :  { %v109_v54 = vadd.f32 %v1690_v52, %v108_v53 }
 0x114   :  { %1694 = vtanh.f32 %v109_v54 }
 0x11a   :  { %v1695_v55 = vpop.eup %1694 }
 0x11b   :  { %148 = vmatmul.f32.vlgmr.msra.gmra.mxu2 %v1695_v55 }
 0x11c   :  { %329 = vmatpush.msra.mxu2 %v1910_v17 }
 0x11e   :  { %330 = vmatpush.msra.mxu2 %v1916_v18 }
 0x120   :  { %331 = vmatpush.msra.mxu2 %v1924_v20 }
 0x122   :  { %332 = vmatpush.msra.mxu2 %v1935_v22 }
 0x124   :  { %333 = vmatpush.msra.mxu2 %v1946_v24 }
 0x126   :  { %334 = vmatpush.msra.mxu2 %v1957_v26 }
 0x128   :  { %335 = vmatpush.msra.mxu2 %v1968_v28 }
 0x12a   :  { %336 = vmatpush.msra.mxu2 %v1979_v30 }
 0x12c   :  { %337 = vmatpush.msra.mxu2 %v1990_v32 }
 0x12e   :  { %338 = vmatpush.msra.mxu2 %v2001_v34 }
 0x130   :  { %339 = vmatpush.msra.mxu2 %v2023_v41 }
 0x132   :  { %340 = vmatpush.msra.mxu2 %v2032_v43 }
 0x134   :  { %341 = vmatpush.msra.mxu2 %v2043_v45 }
 0x136   :  { %342 = vmatpush.msra.mxu2 %v2051_v47 }
 0x138   :  { %343 = vmatpush.msra.mxu2 %v2062_v49 }
 0x13a   :  { %344 = vmatpush.msra.mxu2 %v2073_v50 }
 0x19e   :  { %v149_v57 = vpop.f32.mrf.mxu2 }
 0x19f   :  { %v2182_v59 = vadd.f32 %v1691_v56, %v149_v57  ;;  %v2509_v56 = vld [vmem:[%s3587_s7 + $0x60] sm:$0xff]  ;;  %v2515_v57 = vld [vmem:[%s3587_s7 + $0x58] sm:$0xff] }
 0x1a1   :  { %v188_v60 = vadd.f32 %v185_v58, %v2182_v59  ;;  %v2521_v58 = vld [vmem:[%s3587_s7 + $0x50] sm:$0xff] }
 0x1a3   :  { %1696 = vtanh.f32 %v188_v60 }
 0x1a9   :  { %v2185_v61 = vpop.eup %1696 }
 0x1aa   :  { %207 = vmatmul.f32.vlgmr.msrb.gmra.mxu0 %v2185_v61 }
 0x1ab   :  { %375 = vmatpush.msrb.mxu0 %v1910_v17 }
 0x1ad   :  { %376 = vmatpush.msrb.mxu0 %v1916_v18 }
 0x1af   :  { %377 = vmatpush.msrb.mxu0 %v1924_v20 }
 0x1b1   :  { %378 = vmatpush.msrb.mxu0 %v1935_v22 }
 0x1b3   :  { %379 = vmatpush.msrb.mxu0 %v1946_v24 }
 0x1b5   :  { %380 = vmatpush.msrb.mxu0 %v1957_v26 }
 0x1b7   :  { %381 = vmatpush.msrb.mxu0 %v1968_v28 }
 0x1b9   :  { %382 = vmatpush.msrb.mxu0 %v1979_v30 }
 0x1bb   :  { %383 = vmatpush.msrb.mxu0 %v1990_v32 }
 0x1bd   :  { %384 = vmatpush.msrb.mxu0 %v2001_v34 }
 0x1bf   :  { %385 = vmatpush.msrb.mxu0 %v2023_v41 }
 0x1c1   :  { %386 = vmatpush.msrb.mxu0 %v2032_v43 }
 0x1c3   :  { %387 = vmatpush.msrb.mxu0 %v2043_v45 }
 0x1c5   :  { %388 = vmatpush.msrb.mxu0 %v2051_v47 }
 0x1c7   :  { %389 = vmatpush.msrb.mxu0 %v2062_v49 }
 0x1c9   :  { %390 = vmatpush.msrb.mxu0 %v2073_v50 }
 0x227   :  { %v208_v62 = vpop.f32.mrf.mxu0 }
 0x228   :  { %v211_v63 = vadd.f32 %v208_v62, %v2182_v59  ;;  %v2559_v62 = vld [vmem:[%s3587_s7 + $0x38] sm:$0xff] }
 0x22a   :  { %1698 = vtanh.f32 %v211_v63  ;;  %v2565_v63 = vld [vmem:[%s3587_s7 + $0x30] sm:$0xff] }
 0x230   :  { %v2205_v0 = vpop.eup %1698 }
 0x231   :  { %230 = vmatmul.f32.vlgmr.msrb.gmra.mxu1 %v2205_v0 }
 0x232   :  { %398 = vmatpush.msrb.mxu1 %v1910_v17 }
 0x234   :  { %399 = vmatpush.msrb.mxu1 %v1916_v18 }
 0x236   :  { %400 = vmatpush.msrb.mxu1 %v1924_v20 }
 0x238   :  { %401 = vmatpush.msrb.mxu1 %v1935_v22 }
 0x23a   :  { %402 = vmatpush.msrb.mxu1 %v1946_v24 }
 0x23c   :  { %403 = vmatpush.msrb.mxu1 %v1957_v26 }
 0x23e   :  { %404 = vmatpush.msrb.mxu1 %v1968_v28 }
 0x240   :  { %405 = vmatpush.msrb.mxu1 %v1979_v30 }
 0x242   :  { %406 = vmatpush.msrb.mxu1 %v1990_v32 }
 0x244   :  { %407 = vmatpush.msrb.mxu1 %v2001_v34 }
 0x246   :  { %408 = vmatpush.msrb.mxu1 %v2023_v41 }
 0x248   :  { %409 = vmatpush.msrb.mxu1 %v2032_v43 }
 0x24a   :  { %410 = vmatpush.msrb.mxu1 %v2043_v45 }
 0x24c   :  { %411 = vmatpush.msrb.mxu1 %v2051_v47 }
 0x24e   :  { %412 = vmatpush.msrb.mxu1 %v2062_v49 }
 0x250   :  { %413 = vmatpush.msrb.mxu1 %v2073_v50 }
 0x2ae   :  { %v231_v1 = vpop.f32.mrf.mxu1 }
 0x2af   :  { %v234_v2 = vadd.f32 %v231_v1, %v2182_v59 }
 0x2b1   :  { %1700 = vtanh.f32 %v234_v2 }
 0x2b7   :  { %v2225_v3 = vpop.eup %1700 }
 0x2b8   :  { %253 = vmatmul.f32.vlgmr.msrb.gmra.mxu2 %v2225_v3 }
 0x2b9   :  { %421 = vmatpush.msrb.mxu2 %v1910_v17 }
 0x2bb   :  { %422 = vmatpush.msrb.mxu2 %v1916_v18 }
 0x2bd   :  { %423 = vmatpush.msrb.mxu2 %v1924_v20 }
 0x2bf   :  { %424 = vmatpush.msrb.mxu2 %v1935_v22 }
 0x2c1   :  { %425 = vmatpush.msrb.mxu2 %v1946_v24 }
 0x2c3   :  { %426 = vmatpush.msrb.mxu2 %v1957_v26 }
 0x2c5   :  { %427 = vmatpush.msrb.mxu2 %v1968_v28 }
 0x2c7   :  { %428 = vmatpush.msrb.mxu2 %v1979_v30 }
 0x2c9   :  { %429 = vmatpush.msrb.mxu2 %v1990_v32 }
 0x2cb   :  { %430 = vmatpush.msrb.mxu2 %v2001_v34 }
 0x2cd   :  { %431 = vmatpush.msrb.mxu2 %v2023_v41 }
 0x2cf   :  { %432 = vmatpush.msrb.mxu2 %v2032_v43 }
 0x2d1   :  { %433 = vmatpush.msrb.mxu2 %v2043_v45 }
 0x2d3   :  { %434 = vmatpush.msrb.mxu2 %v2051_v47 }
 0x2d5   :  { %435 = vmatpush.msrb.mxu2 %v2062_v49 }
 0x2d7   :  { %436 = vmatpush.msrb.mxu2 %v2073_v50 }
 0x33b   :  { %v254_v4 = vpop.f32.mrf.mxu2 }
 0x33c   :  { %v257_v5 = vadd.f32 %v254_v4, %v2182_v59 }
 0x33e   :  { %1702 = vtanh.f32 %v257_v5 }
 0x344   :  { %v2245_v6 = vpop.eup %1702 }
 0x345   :  { %276 = vmatmul.f32.vlgmr.msrb.gmra.mxu3 %v2245_v6 }
 0x346   :  { %444 = vmatpush.msrb.mxu3 %v1910_v17 }
 0x348   :  { %445 = vmatpush.msrb.mxu3 %v1916_v18 }
 0x34a   :  { %446 = vmatpush.msrb.mxu3 %v1924_v20 }
 0x34c   :  { %447 = vmatpush.msrb.mxu3 %v1935_v22 }
 0x34e   :  { %448 = vmatpush.msrb.mxu3 %v1946_v24 }
 0x350   :  { %449 = vmatpush.msrb.mxu3 %v1957_v26 }
 0x352   :  { %450 = vmatpush.msrb.mxu3 %v1968_v28 }
 0x354   :  { %451 = vmatpush.msrb.mxu3 %v1979_v30 }
 0x356   :  { %452 = vmatpush.msrb.mxu3 %v1990_v32 }
 0x358   :  { %453 = vmatpush.msrb.mxu3 %v2001_v34 }
 0x35a   :  { %454 = vmatpush.msrb.mxu3 %v2023_v41 }
 0x35c   :  { %455 = vmatpush.msrb.mxu3 %v2032_v43 }
 0x35e   :  { %456 = vmatpush.msrb.mxu3 %v2043_v45 }
 0x360   :  { %457 = vmatpush.msrb.mxu3 %v2051_v47 }
 0x362   :  { %458 = vmatpush.msrb.mxu3 %v2062_v49 }
 0x364   :  { %459 = vmatpush.msrb.mxu3 %v2073_v50 }
 0x3c8   :  { %v277_v7 = vpop.f32.mrf.mxu3 }
 0x3c9   :  { %v280_v8 = vadd.f32 %v277_v7, %v2182_v59 }
 0x3cb   :  { %1704 = vtanh.f32 %v280_v8 }
 0x3d1   :  { %v2265_v9 = vpop.eup %1704 }
 0x3d2   :  { %299 = vmatmul.f32.vlgmr.msra.gmra.mxu0 %v2265_v9 }
 0x3d3   :  { %467 = vmatpush.msra.mxu0 %v1910_v17 }
 0x3d5   :  { %468 = vmatpush.msra.mxu0 %v1916_v18 }
 0x3d7   :  { %469 = vmatpush.msra.mxu0 %v1924_v20 }
 0x3d9   :  { %470 = vmatpush.msra.mxu0 %v1935_v22 }
 0x3db   :  { %471 = vmatpush.msra.mxu0 %v1946_v24 }
 0x3dd   :  { %472 = vmatpush.msra.mxu0 %v1957_v26 }
 0x3df   :  { %473 = vmatpush.msra.mxu0 %v1968_v28 }
 0x3e1   :  { %474 = vmatpush.msra.mxu0 %v1979_v30 }
 0x3e3   :  { %475 = vmatpush.msra.mxu0 %v1990_v32 }
 0x3e5   :  { %476 = vmatpush.msra.mxu0 %v2001_v34 }
 0x3e7   :  { %477 = vmatpush.msra.mxu0 %v2023_v41 }
 0x3e9   :  { %478 = vmatpush.msra.mxu0 %v2032_v43 }
 0x3eb   :  { %479 = vmatpush.msra.mxu0 %v2043_v45 }
 0x3ed   :  { %480 = vmatpush.msra.mxu0 %v2051_v47 }
 0x3ef   :  { %481 = vmatpush.msra.mxu0 %v2062_v49 }
 0x3f1   :  { %482 = vmatpush.msra.mxu0 %v2073_v50 }
 0x44f   :  { %v300_v10 = vpop.f32.mrf.mxu0 }
 0x450   :  { %v303_v11 = vadd.f32 %v300_v10, %v2182_v59 }
 0x452   :  { %1706 = vtanh.f32 %v303_v11 }
 0x458   :  { %v2285_v12 = vpop.eup %1706 }
 0x459   :  { %322 = vmatmul.f32.vlgmr.msra.gmra.mxu1 %v2285_v12 }
 0x45a   :  { %490 = vmatpush.msra.mxu1 %v1910_v17 }
 0x45c   :  { %491 = vmatpush.msra.mxu1 %v1916_v18 }
 0x45e   :  { %492 = vmatpush.msra.mxu1 %v1924_v20 }
 0x460   :  { %493 = vmatpush.msra.mxu1 %v1935_v22 }
 0x462   :  { %494 = vmatpush.msra.mxu1 %v1946_v24 }
 0x464   :  { %495 = vmatpush.msra.mxu1 %v1957_v26 }
 0x466   :  { %496 = vmatpush.msra.mxu1 %v1968_v28 }
 0x468   :  { %497 = vmatpush.msra.mxu1 %v1979_v30 }
 0x46a   :  { %498 = vmatpush.msra.mxu1 %v1990_v32 }
 0x46c   :  { %499 = vmatpush.msra.mxu1 %v2001_v34 }
 0x46e   :  { %500 = vmatpush.msra.mxu1 %v2023_v41 }
 0x470   :  { %501 = vmatpush.msra.mxu1 %v2032_v43 }
 0x472   :  { %502 = vmatpush.msra.mxu1 %v2043_v45 }
 0x474   :  { %503 = vmatpush.msra.mxu1 %v2051_v47 }
 0x476   :  { %504 = vmatpush.msra.mxu1 %v2062_v49 }
 0x478   :  { %505 = vmatpush.msra.mxu1 %v2073_v50 }
 0x4d6   :  { %v323_v13 = vpop.f32.mrf.mxu1 }
 0x4d7   :  { %v326_v14 = vadd.f32 %v323_v13, %v2182_v59 }
 0x4d9   :  { %1708 = vtanh.f32 %v326_v14 }
 0x4df   :  { %v2305_v15 = vpop.eup %1708 }
 0x4e0   :  { %345 = vmatmul.f32.vlgmr.msra.gmra.mxu2 %v2305_v15 }
 0x4e1   :  { %513 = vmatpush.msra.mxu2 %v1910_v17 }
 0x4e3   :  { %514 = vmatpush.msra.mxu2 %v1916_v18 }
 0x4e5   :  { %515 = vmatpush.msra.mxu2 %v1924_v20 }
 0x4e7   :  { %516 = vmatpush.msra.mxu2 %v1935_v22 }
 0x4e9   :  { %517 = vmatpush.msra.mxu2 %v1946_v24 }
 0x4eb   :  { %518 = vmatpush.msra.mxu2 %v1957_v26 }
 0x4ed   :  { %519 = vmatpush.msra.mxu2 %v1968_v28 }
 0x4ef   :  { %520 = vmatpush.msra.mxu2 %v1979_v30 }
 0x4f1   :  { %521 = vmatpush.msra.mxu2 %v1990_v32 }
 0x4f3   :  { %522 = vmatpush.msra.mxu2 %v2001_v34 }
 0x4f5   :  { %523 = vmatpush.msra.mxu2 %v2023_v41 }
 0x4f7   :  { %524 = vmatpush.msra.mxu2 %v2032_v43 }
 0x4f9   :  { %525 = vmatpush.msra.mxu2 %v2043_v45 }
 0x4fb   :  { %526 = vmatpush.msra.mxu2 %v2051_v47 }
 0x4fd   :  { %527 = vmatpush.msra.mxu2 %v2062_v49 }
 0x4ff   :  { %528 = vmatpush.msra.mxu2 %v2073_v50 }
 0x563   :  { %v346_v16 = vpop.f32.mrf.mxu2 }
 0x564   :  { %v349_v19 = vadd.f32 %v346_v16, %v2182_v59 }
 0x566   :  { %1710 = vtanh.f32 %v349_v19 }
 0x56c   :  { %v2325_v21 = vpop.eup %1710 }
 0x56d   :  { %368 = vmatmul.f32.vlgmr.msra.gmra.mxu3 %v2325_v21 }
 0x56e   :  { %536 = vmatpush.msra.mxu3 %v1910_v17 }
 0x570   :  { %537 = vmatpush.msra.mxu3 %v1916_v18 }
 0x572   :  { %538 = vmatpush.msra.mxu3 %v1924_v20 }
 0x574   :  { %539 = vmatpush.msra.mxu3 %v1935_v22 }
 0x576   :  { %540 = vmatpush.msra.mxu3 %v1946_v24 }
 0x578   :  { %541 = vmatpush.msra.mxu3 %v1957_v26 }
 0x57a   :  { %542 = vmatpush.msra.mxu3 %v1968_v28 }
 0x57c   :  { %543 = vmatpush.msra.mxu3 %v1979_v30 }
 0x57e   :  { %544 = vmatpush.msra.mxu3 %v1990_v32 }
 0x580   :  { %545 = vmatpush.msra.mxu3 %v2001_v34 }
 0x582   :  { %546 = vmatpush.msra.mxu3 %v2023_v41 }
 0x584   :  { %547 = vmatpush.msra.mxu3 %v2032_v43 }
 0x586   :  { %548 = vmatpush.msra.mxu3 %v2043_v45 }
 0x588   :  { %549 = vmatpush.msra.mxu3 %v2051_v47 }
 0x58a   :  { %550 = vmatpush.msra.mxu3 %v2062_v49 }
 0x58c   :  { %551 = vmatpush.msra.mxu3 %v2073_v50 }
 0x5f0   :  { %v369_v23 = vpop.f32.mrf.mxu3 }
 0x5f1   :  { %v372_v25 = vadd.f32 %v369_v23, %v2182_v59 }
 0x5f3   :  { %1712 = vtanh.f32 %v372_v25 }
 0x5f9   :  { %v2345_v27 = vpop.eup %1712 }
 0x5fa   :  { %391 = vmatmul.f32.vlgmr.msrb.gmra.mxu0 %v2345_v27 }
 0x5fb   :  { %559 = vmatpush.msrb.mxu0 %v1910_v17 }
 0x5fd   :  { %560 = vmatpush.msrb.mxu0 %v1916_v18 }
 0x5ff   :  { %561 = vmatpush.msrb.mxu0 %v1924_v20 }
 0x601   :  { %562 = vmatpush.msrb.mxu0 %v1935_v22 }
 0x603   :  { %563 = vmatpush.msrb.mxu0 %v1946_v24 }
 0x605   :  { %564 = vmatpush.msrb.mxu0 %v1957_v26 }
 0x607   :  { %565 = vmatpush.msrb.mxu0 %v1968_v28 }
 0x609   :  { %566 = vmatpush.msrb.mxu0 %v1979_v30 }
 0x60b   :  { %567 = vmatpush.msrb.mxu0 %v1990_v32 }
 0x60d   :  { %568 = vmatpush.msrb.mxu0 %v2001_v34 }
 0x60f   :  { %569 = vmatpush.msrb.mxu0 %v2023_v41 }
 0x611   :  { %570 = vmatpush.msrb.mxu0 %v2032_v43 }
 0x613   :  { %571 = vmatpush.msrb.mxu0 %v2043_v45 }
 0x615   :  { %572 = vmatpush.msrb.mxu0 %v2051_v47 }
 0x617   :  { %573 = vmatpush.msrb.mxu0 %v2062_v49 }
 0x619   :  { %574 = vmatpush.msrb.mxu0 %v2073_v50 }
 0x677   :  { %v392_v29 = vpop.f32.mrf.mxu0 }
 0x678   :  { %v395_v31 = vadd.f32 %v392_v29, %v2182_v59 }
 0x67a   :  { %1714 = vtanh.f32 %v395_v31 }
 0x680   :  { %v2365_v33 = vpop.eup %1714 }
 0x681   :  { %414 = vmatmul.f32.vlgmr.msrb.gmra.mxu1 %v2365_v33 }
 0x682   :  { %582 = vmatpush.msrb.mxu1 %v1910_v17 }
 0x684   :  { %583 = vmatpush.msrb.mxu1 %v1916_v18 }
 0x686   :  { %584 = vmatpush.msrb.mxu1 %v1924_v20 }
 0x688   :  { %585 = vmatpush.msrb.mxu1 %v1935_v22 }
 0x68a   :  { %586 = vmatpush.msrb.mxu1 %v1946_v24 }
 0x68c   :  { %587 = vmatpush.msrb.mxu1 %v1957_v26 }
 0x68e   :  { %588 = vmatpush.msrb.mxu1 %v1968_v28 }
 0x690   :  { %589 = vmatpush.msrb.mxu1 %v1979_v30 }
 0x692   :  { %590 = vmatpush.msrb.mxu1 %v1990_v32 }
 0x694   :  { %591 = vmatpush.msrb.mxu1 %v2001_v34 }
 0x696   :  { %592 = vmatpush.msrb.mxu1 %v2023_v41 }
 0x698   :  { %593 = vmatpush.msrb.mxu1 %v2032_v43 }
 0x69a   :  { %594 = vmatpush.msrb.mxu1 %v2043_v45 }
 0x69c   :  { %595 = vmatpush.msrb.mxu1 %v2051_v47 }
 0x69e   :  { %596 = vmatpush.msrb.mxu1 %v2062_v49 }
 0x6a0   :  { %597 = vmatpush.msrb.mxu1 %v2073_v50 }
 0x6fe   :  { %v415_v35 = vpop.f32.mrf.mxu1 }
 0x6ff   :  { %v418_v36 = vadd.f32 %v415_v35, %v2182_v59 }
 0x701   :  { %1716 = vtanh.f32 %v418_v36 }
 0x707   :  { %v2385_v37 = vpop.eup %1716 }
 0x708   :  { %437 = vmatmul.f32.vlgmr.msrb.gmra.mxu2 %v2385_v37 }
 0x709   :  { %605 = vmatpush.msrb.mxu2 %v1910_v17 }
 0x70b   :  { %606 = vmatpush.msrb.mxu2 %v1916_v18 }
 0x70d   :  { %607 = vmatpush.msrb.mxu2 %v1924_v20 }
 0x70f   :  { %608 = vmatpush.msrb.mxu2 %v1935_v22 }
 0x711   :  { %609 = vmatpush.msrb.mxu2 %v1946_v24 }
 0x713   :  { %610 = vmatpush.msrb.mxu2 %v1957_v26 }
 0x715   :  { %611 = vmatpush.msrb.mxu2 %v1968_v28 }
 0x717   :  { %612 = vmatpush.msrb.mxu2 %v1979_v30 }
 0x719   :  { %613 = vmatpush.msrb.mxu2 %v1990_v32 }
 0x71b   :  { %614 = vmatpush.msrb.mxu2 %v2001_v34 }
 0x71d   :  { %615 = vmatpush.msrb.mxu2 %v2023_v41 }
 0x71f   :  { %616 = vmatpush.msrb.mxu2 %v2032_v43 }
 0x721   :  { %617 = vmatpush.msrb.mxu2 %v2043_v45 }
 0x723   :  { %618 = vmatpush.msrb.mxu2 %v2051_v47 }
 0x725   :  { %619 = vmatpush.msrb.mxu2 %v2062_v49 }
 0x727   :  { %620 = vmatpush.msrb.mxu2 %v2073_v50 }
 0x78b   :  { %v438_v38 = vpop.f32.mrf.mxu2 }
 0x78c   :  { %v441_v39 = vadd.f32 %v438_v38, %v2182_v59 }
 0x78e   :  { %1718 = vtanh.f32 %v441_v39 }
 0x794   :  { %v2405_v40 = vpop.eup %1718 }
 0x795   :  { %460 = vmatmul.f32.vlgmr.msrb.gmra.mxu3 %v2405_v40 }
 0x796   :  { %628 = vmatpush.msrb.mxu3 %v1910_v17 }
 0x798   :  { %629 = vmatpush.msrb.mxu3 %v1916_v18 }
 0x79a   :  { %630 = vmatpush.msrb.mxu3 %v1924_v20 }
 0x79c   :  { %631 = vmatpush.msrb.mxu3 %v1935_v22 }
 0x79e   :  { %632 = vmatpush.msrb.mxu3 %v1946_v24 }
 0x7a0   :  { %633 = vmatpush.msrb.mxu3 %v1957_v26 }
 0x7a2   :  { %634 = vmatpush.msrb.mxu3 %v1968_v28 }
 0x7a4   :  { %635 = vmatpush.msrb.mxu3 %v1979_v30 }
 0x7a6   :  { %636 = vmatpush.msrb.mxu3 %v1990_v32 }
 0x7a8   :  { %637 = vmatpush.msrb.mxu3 %v2001_v34 }
 0x7aa   :  { %638 = vmatpush.msrb.mxu3 %v2023_v41 }
 0x7ac   :  { %639 = vmatpush.msrb.mxu3 %v2032_v43 }
 0x7ae   :  { %640 = vmatpush.msrb.mxu3 %v2043_v45 }
 0x7b0   :  { %641 = vmatpush.msrb.mxu3 %v2051_v47 }
 0x7b2   :  { %642 = vmatpush.msrb.mxu3 %v2062_v49 }
 0x7b4   :  { %643 = vmatpush.msrb.mxu3 %v2073_v50 }
 0x818   :  { %v461_v42 = vpop.f32.mrf.mxu3 }
 0x819   :  { %v464_v44 = vadd.f32 %v461_v42, %v2182_v59 }
 0x81b   :  { %1720 = vtanh.f32 %v464_v44 }
 0x821   :  { %v2425_v46 = vpop.eup %1720 }
 0x822   :  { %483 = vmatmul.f32.vlgmr.msra.gmra.mxu0 %v2425_v46 }
 0x823   :  { %651 = vmatpush.msra.mxu0 %v1910_v17 }
 0x825   :  { %652 = vmatpush.msra.mxu0 %v1916_v18 }
 0x827   :  { %653 = vmatpush.msra.mxu0 %v1924_v20 }
 0x829   :  { %654 = vmatpush.msra.mxu0 %v1935_v22 }
 0x82b   :  { %655 = vmatpush.msra.mxu0 %v1946_v24 }
 0x82d   :  { %656 = vmatpush.msra.mxu0 %v1957_v26 }
 0x82f   :  { %657 = vmatpush.msra.mxu0 %v1968_v28 }
 0x831   :  { %658 = vmatpush.msra.mxu0 %v1979_v30 }
 0x833   :  { %659 = vmatpush.msra.mxu0 %v1990_v32 }
 0x835   :  { %660 = vmatpush.msra.mxu0 %v2001_v34 }
 0x837   :  { %661 = vmatpush.msra.mxu0 %v2023_v41 }
 0x839   :  { %662 = vmatpush.msra.mxu0 %v2032_v43 }
 0x83b   :  { %663 = vmatpush.msra.mxu0 %v2043_v45 }
 0x83d   :  { %664 = vmatpush.msra.mxu0 %v2051_v47 }
 0x83f   :  { %665 = vmatpush.msra.mxu0 %v2062_v49 }
 0x841   :  { %666 = vmatpush.msra.mxu0 %v2073_v50 }
 0x89f   :  { %v484_v48 = vpop.f32.mrf.mxu0 }
 0x8a0   :  { %v487_v51 = vadd.f32 %v484_v48, %v2182_v59 }
 0x8a2   :  { %1722 = vtanh.f32 %v487_v51 }
 0x8a8   :  { %v2445_v52 = vpop.eup %1722 }
 0x8a9   :  { %506 = vmatmul.f32.vlgmr.msra.gmra.mxu1 %v2445_v52 }
 0x8aa   :  { %674 = vmatpush.msra.mxu1 %v1910_v17 }
 0x8ac   :  { %675 = vmatpush.msra.mxu1 %v1916_v18 }
 0x8ae   :  { %676 = vmatpush.msra.mxu1 %v1924_v20 }
 0x8b0   :  { %677 = vmatpush.msra.mxu1 %v1935_v22 }
 0x8b2   :  { %678 = vmatpush.msra.mxu1 %v1946_v24 }
 0x8b4   :  { %679 = vmatpush.msra.mxu1 %v1957_v26 }
 0x8b6   :  { %680 = vmatpush.msra.mxu1 %v1968_v28 }
 0x8b8   :  { %681 = vmatpush.msra.mxu1 %v1979_v30 }
 0x8ba   :  { %682 = vmatpush.msra.mxu1 %v1990_v32 }
 0x8bc   :  { %683 = vmatpush.msra.mxu1 %v2001_v34 }
 0x8be   :  { %684 = vmatpush.msra.mxu1 %v2023_v41 }
 0x8c0   :  { %685 = vmatpush.msra.mxu1 %v2032_v43 }
 0x8c2   :  { %686 = vmatpush.msra.mxu1 %v2043_v45 }
 0x8c4   :  { %687 = vmatpush.msra.mxu1 %v2051_v47 }
 0x8c6   :  { %688 = vmatpush.msra.mxu1 %v2062_v49 }
 0x8c8   :  { %689 = vmatpush.msra.mxu1 %v2073_v50 }
 0x926   :  { %v507_v53 = vpop.f32.mrf.mxu1 }
 0x927   :  { %v510_v54 = vadd.f32 %v507_v53, %v2182_v59 }
 0x929   :  { %1724 = vtanh.f32 %v510_v54 }
 0x92f   :  { %v2465_v55 = vpop.eup %1724 }
 0x930   :  { %529 = vmatmul.f32.vlgmr.msra.gmra.mxu2 %v2465_v55 }
 0x931   :  { %697 = vmatpush.msra.mxu2 %v1910_v17 }
 0x933   :  { %698 = vmatpush.msra.mxu2 %v1916_v18 }
 0x935   :  { %699 = vmatpush.msra.mxu2 %v1924_v20 }
 0x937   :  { %700 = vmatpush.msra.mxu2 %v1935_v22  ;;  %v2491_v22 = vld [vmem:[%s3587_s7 + $0x78] sm:$0xff] }
 0x939   :  { %701 = vmatpush.msra.mxu2 %v1946_v24  ;;  %v2497_v24 = vld [vmem:[%s3587_s7 + $0x70] sm:$0xff] }
 0x93b   :  { %702 = vmatpush.msra.mxu2 %v1957_v26  ;;  %v2503_v26 = vld [vmem:[%s3587_s7 + $0x68] sm:$0xff] }
 0x93d   :  { %703 = vmatpush.msra.mxu2 %v1968_v28 }
 0x93f   :  { %704 = vmatpush.msra.mxu2 %v1979_v30 }
 0x941   :  { %705 = vmatpush.msra.mxu2 %v1990_v32 }
 0x943   :  { %706 = vmatpush.msra.mxu2 %v2001_v34 }
 0x945   :  { %707 = vmatpush.msra.mxu2 %v2023_v41 }
 0x947   :  { %708 = vmatpush.msra.mxu2 %v2032_v43 }
 0x949   :  { %709 = vmatpush.msra.mxu2 %v2043_v45 }
 0x94b   :  { %710 = vmatpush.msra.mxu2 %v2051_v47 }
 0x94d   :  { %711 = vmatpush.msra.mxu2 %v2062_v49 }
 0x94f   :  { %712 = vmatpush.msra.mxu2 %v2073_v50 }
 0x9b3   :  { %v530_v17 = vpop.f32.mrf.mxu2 }
 0x9b4   :  { %v533_v18 = vadd.f32 %v530_v17, %v2182_v59 }
 0x9b6   :  { %1726 = vtanh.f32 %v533_v18 }
 0x9bc   :  { %v2485_v20 = vpop.eup %1726 }
 0x9bd   :  { %552 = vmatmul.f32.vlgmr.msra.gmra.mxu3 %v2485_v20 }
 0x9be   :  { %720 = vmatpush.msra.mxu3 %v2491_v22 }
 0x9c0   :  { %721 = vmatpush.msra.mxu3 %v2497_v24 }
 0x9c2   :  { %722 = vmatpush.msra.mxu3 %v2503_v26 }
 0x9c4   :  { %723 = vmatpush.msra.mxu3 %v2509_v56 }
 0x9c6   :  { %724 = vmatpush.msra.mxu3 %v2515_v57 }
 0x9c8   :  { %725 = vmatpush.msra.mxu3 %v2521_v58 }
 0x9ca   :  { %726 = vmatpush.msra.mxu3 %v1968_v28 }
 0x9cc   :  { %727 = vmatpush.msra.mxu3 %v1979_v30 }
 0x9ce   :  { %728 = vmatpush.msra.mxu3 %v1990_v32  ;;  %v2547_v32 = vld [vmem:[%s3587_s7 + $0x48] sm:$0xff] }
 0x9d0   :  { %729 = vmatpush.msra.mxu3 %v2001_v34  ;;  %v2553_v34 = vld [vmem:[%s3587_s7 + $0x40] sm:$0xff] }
 0x9d2   :  { %730 = vmatpush.msra.mxu3 %v2023_v41 }
 0x9d4   :  { %731 = vmatpush.msra.mxu3 %v2032_v43 }
 0x9d6   :  { %732 = vmatpush.msra.mxu3 %v2043_v45 }
 0x9d8   :  { %733 = vmatpush.msra.mxu3 %v2051_v47 }
 0x9da   :  { %734 = vmatpush.msra.mxu3 %v2062_v49 }
 0x9dc   :  { %735 = vmatpush.msra.mxu3 %v2073_v50 }
 0xa40   :  { %v553_v60 = vpop.f32.mrf.mxu3 }
 0xa41   :  { %v556_v28 = vadd.f32 %v553_v60, %v2182_v59 }
 0xa43   :  { %1728 = vtanh.f32 %v556_v28 }
 0xa49   :  { %v2535_v30 = vpop.eup %1728 }
 0xa4a   :  { %575 = vmatmul.f32.vlgmr.msrb.gmra.mxu0 %v2535_v30 }
 0xa4b   :  { %743 = vmatpush.msrb.mxu0 %v2491_v22 }
 0xa4d   :  { %744 = vmatpush.msrb.mxu0 %v2497_v24 }
 0xa4f   :  { %745 = vmatpush.msrb.mxu0 %v2503_v26 }
 0xa51   :  { %746 = vmatpush.msrb.mxu0 %v2509_v56 }
 0xa53   :  { %747 = vmatpush.msrb.mxu0 %v2515_v57 }
 0xa55   :  { %748 = vmatpush.msrb.mxu0 %v2521_v58 }
 0xa57   :  { %749 = vmatpush.msrb.mxu0 %v2547_v32 }
 0xa59   :  { %750 = vmatpush.msrb.mxu0 %v2553_v34 }
 0xa5b   :  { %751 = vmatpush.msrb.mxu0 %v2559_v62 }
 0xa5d   :  { %752 = vmatpush.msrb.mxu0 %v2565_v63 }
 0xa5f   :  { %753 = vmatpush.msrb.mxu0 %v2023_v41  ;;  %v2591_v41 = vld [vmem:[%s3587_s7 + $0x28] sm:$0xff] }
 0xa61   :  { %754 = vmatpush.msrb.mxu0 %v2032_v43 }
 0xa63   :  { %755 = vmatpush.msrb.mxu0 %v2043_v45 }
 0xa65   :  { %756 = vmatpush.msrb.mxu0 %v2051_v47 }
 0xa67   :  { %757 = vmatpush.msrb.mxu0 %v2062_v49 }
 0xa69   :  { %758 = vmatpush.msrb.mxu0 %v2073_v50 }
 0xac7   :  { %v576_v1 = vpop.f32.mrf.mxu0 }
 0xac8   :  { %v579_v2 = vadd.f32 %v576_v1, %v2182_v59 }
 0xaca   :  { %1730 = vtanh.f32 %v579_v2 }
 0xad0   :  { %v2575_v4 = vpop.eup %1730 }
 0xad1   :  { %598 = vmatmul.f32.vlgmr.msrb.gmra.mxu1 %v2575_v4 }
 0xad2   :  { %766 = vmatpush.msrb.mxu1 %v2491_v22 }
 0xad4   :  { %767 = vmatpush.msrb.mxu1 %v2497_v24 }
 0xad6   :  { %768 = vmatpush.msrb.mxu1 %v2503_v26 }
 0xad8   :  { %769 = vmatpush.msrb.mxu1 %v2509_v56 }
 0xada   :  { %770 = vmatpush.msrb.mxu1 %v2515_v57 }
 0xadc   :  { %771 = vmatpush.msrb.mxu1 %v2521_v58 }
 0xade   :  { %772 = vmatpush.msrb.mxu1 %v2547_v32 }
 0xae0   :  { %773 = vmatpush.msrb.mxu1 %v2553_v34 }
 0xae2   :  { %774 = vmatpush.msrb.mxu1 %v2559_v62 }
 0xae4   :  { %775 = vmatpush.msrb.mxu1 %v2565_v63 }
 0xae6   :  { %776 = vmatpush.msrb.mxu1 %v2591_v41 }
 0xae8   :  { %777 = vmatpush.msrb.mxu1 %v2032_v43  ;;  %v2617_v43 = vld [vmem:[%s3587_s7 + $0x20] sm:$0xff] }
 0xaea   :  { %778 = vmatpush.msrb.mxu1 %v2043_v45  ;;  %v2623_v45 = vld [vmem:[%s3587_s7 + $0x18] sm:$0xff] }
 0xaec   :  { %779 = vmatpush.msrb.mxu1 %v2051_v47  ;;  %v2629_v47 = vld [vmem:[%s3587_s7 + $0x10] sm:$0xff] }
 0xaee   :  { %780 = vmatpush.msrb.mxu1 %v2062_v49  ;;  %v2635_v49 = vld [vmem:[%s3587_s7 + $0x8] sm:$0xff] }
 0xaf0   :  { %781 = vmatpush.msrb.mxu1 %v2073_v50 }
 0xb4e   :  { %v599_v5 = vpop.f32.mrf.mxu1 }
 0xb4f   :  { %v602_v7 = vadd.f32 %v599_v5, %v2182_v59 }
 0xb51   :  { %1732 = vtanh.f32 %v602_v7 }
 0xb57   :  { %v2600_v8 = vpop.eup %1732 }
 0xb58   :  { %621 = vmatmul.f32.vlgmr.msrb.gmra.mxu2 %v2600_v8 }
 0xb59   :  { %789 = vmatpush.msrb.mxu2 %v2491_v22 }
 0xb5b   :  { %790 = vmatpush.msrb.mxu2 %v2497_v24 }
 0xb5d   :  { %791 = vmatpush.msrb.mxu2 %v2503_v26 }
 0xb5f   :  { %792 = vmatpush.msrb.mxu2 %v2509_v56 }
 0xb61   :  { %793 = vmatpush.msrb.mxu2 %v2515_v57 }
 0xb63   :  { %794 = vmatpush.msrb.mxu2 %v2521_v58 }
 0xb65   :  { %795 = vmatpush.msrb.mxu2 %v2547_v32 }
 0xb67   :  { %796 = vmatpush.msrb.mxu2 %v2553_v34 }
 0xb69   :  { %797 = vmatpush.msrb.mxu2 %v2559_v62 }
 0xb6b   :  { %798 = vmatpush.msrb.mxu2 %v2565_v63 }
 0xb6d   :  { %799 = vmatpush.msrb.mxu2 %v2591_v41 }
 0xb6f   :  { %800 = vmatpush.msrb.mxu2 %v2617_v43 }
 0xb71   :  { %801 = vmatpush.msrb.mxu2 %v2623_v45 }
 0xb73   :  { %802 = vmatpush.msrb.mxu2 %v2629_v47 }
 0xb75   :  { %803 = vmatpush.msrb.mxu2 %v2635_v49 }
 0xb77   :  { %804 = vmatpush.msrb.mxu2 %v2073_v50  ;;  %v2661_v50 = vld [vmem:[%s3587_s7] sm:$0xff] }
 0xbdb   :  { %v622_v10 = vpop.f32.mrf.mxu2 }
 0xbdc   :  { %v625_v11 = vadd.f32 %v622_v10, %v2182_v59 }
 0xbde   :  { %1734 = vtanh.f32 %v625_v11 }
 0xbe4   :  { %v2640_v13 = vpop.eup %1734 }
 0xbe5   :  { %644 = vmatmul.f32.vlgmr.msrb.gmra.mxu3 %v2640_v13 }
 0xbe6   :  { %812 = vmatpush.msrb.mxu3 %v2491_v22 }
 0xbe8   :  { %813 = vmatpush.msrb.mxu3 %v2497_v24 }
 0xbea   :  { %814 = vmatpush.msrb.mxu3 %v2503_v26 }
 0xbec   :  { %815 = vmatpush.msrb.mxu3 %v2509_v56 }
 0xbee   :  { %816 = vmatpush.msrb.mxu3 %v2515_v57 }
 0xbf0   :  { %817 = vmatpush.msrb.mxu3 %v2521_v58 }
 0xbf2   :  { %818 = vmatpush.msrb.mxu3 %v2547_v32 }
 0xbf4   :  { %819 = vmatpush.msrb.mxu3 %v2553_v34 }
 0xbf6   :  { %820 = vmatpush.msrb.mxu3 %v2559_v62 }
 0xbf8   :  { %821 = vmatpush.msrb.mxu3 %v2565_v63 }
 0xbfa   :  { %822 = vmatpush.msrb.mxu3 %v2591_v41 }
 0xbfc   :  { %823 = vmatpush.msrb.mxu3 %v2617_v43 }
 0xbfe   :  { %824 = vmatpush.msrb.mxu3 %v2623_v45 }
 0xc00   :  { %825 = vmatpush.msrb.mxu3 %v2629_v47 }
 0xc02   :  { %826 = vmatpush.msrb.mxu3 %v2635_v49 }
 0xc04   :  { %827 = vmatpush.msrb.mxu3 %v2661_v50 }
 0xc68   :  { %v645_v14 = vpop.f32.mrf.mxu3 }
 0xc69   :  { %v648_v16 = vadd.f32 %v645_v14, %v2182_v59 }
 0xc6b   :  { %1736 = vtanh.f32 %v648_v16 }
 0xc71   :  { %v2665_v19 = vpop.eup %1736 }
 0xc72   :  { %667 = vmatmul.f32.vlgmr.msra.gmra.mxu0 %v2665_v19 }
 0xc73   :  { %835 = vmatpush.msra.mxu0 %v2491_v22 }
 0xc75   :  { %836 = vmatpush.msra.mxu0 %v2497_v24 }
 0xc77   :  { %837 = vmatpush.msra.mxu0 %v2503_v26 }
 0xc79   :  { %838 = vmatpush.msra.mxu0 %v2509_v56 }
 0xc7b   :  { %839 = vmatpush.msra.mxu0 %v2515_v57 }
 0xc7d   :  { %840 = vmatpush.msra.mxu0 %v2521_v58 }
 0xc7f   :  { %841 = vmatpush.msra.mxu0 %v2547_v32 }
 0xc81   :  { %842 = vmatpush.msra.mxu0 %v2553_v34 }
 0xc83   :  { %843 = vmatpush.msra.mxu0 %v2559_v62 }
 0xc85   :  { %844 = vmatpush.msra.mxu0 %v2565_v63 }
 0xc87   :  { %845 = vmatpush.msra.mxu0 %v2591_v41 }
 0xc89   :  { %846 = vmatpush.msra.mxu0 %v2617_v43 }
 0xc8b   :  { %847 = vmatpush.msra.mxu0 %v2623_v45 }
 0xc8d   :  { %848 = vmatpush.msra.mxu0 %v2629_v47 }
 0xc8f   :  { %849 = vmatpush.msra.mxu0 %v2635_v49 }
 0xc91   :  { %850 = vmatpush.msra.mxu0 %v2661_v50 }
 0xcef   :  { %v668_v23 = vpop.f32.mrf.mxu0 }
 0xcf0   :  { %v671_v25 = vadd.f32 %v668_v23, %v2182_v59 }
 0xcf2   :  { %1738 = vtanh.f32 %v671_v25 }
 0xcf8   :  { %v2685_v29 = vpop.eup %1738 }
 0xcf9   :  { %690 = vmatmul.f32.vlgmr.msra.gmra.mxu1 %v2685_v29 }
 0xcfa   :  { %858 = vmatpush.msra.mxu1 %v2491_v22 }
 0xcfc   :  { %859 = vmatpush.msra.mxu1 %v2497_v24 }
 0xcfe   :  { %860 = vmatpush.msra.mxu1 %v2503_v26 }
 0xd00   :  { %861 = vmatpush.msra.mxu1 %v2509_v56 }
 0xd02   :  { %862 = vmatpush.msra.mxu1 %v2515_v57 }
 0xd04   :  { %863 = vmatpush.msra.mxu1 %v2521_v58 }
 0xd06   :  { %864 = vmatpush.msra.mxu1 %v2547_v32 }
 0xd08   :  { %865 = vmatpush.msra.mxu1 %v2553_v34 }
 0xd0a   :  { %866 = vmatpush.msra.mxu1 %v2559_v62 }
 0xd0c   :  { %867 = vmatpush.msra.mxu1 %v2565_v63 }
 0xd0e   :  { %868 = vmatpush.msra.mxu1 %v2591_v41 }
 0xd10   :  { %869 = vmatpush.msra.mxu1 %v2617_v43 }
 0xd12   :  { %870 = vmatpush.msra.mxu1 %v2623_v45 }
 0xd14   :  { %871 = vmatpush.msra.mxu1 %v2629_v47 }
 0xd16   :  { %872 = vmatpush.msra.mxu1 %v2635_v49 }
 0xd18   :  { %873 = vmatpush.msra.mxu1 %v2661_v50 }
 0xd76   :  { %v691_v31 = vpop.f32.mrf.mxu1 }
 0xd77   :  { %v694_v35 = vadd.f32 %v691_v31, %v2182_v59 }
 0xd79   :  { %1740 = vtanh.f32 %v694_v35 }
 0xd7f   :  { %v2705_v36 = vpop.eup %1740 }
 0xd80   :  { %713 = vmatmul.f32.vlgmr.msra.gmra.mxu2 %v2705_v36 }
 0xd81   :  { %881 = vmatpush.msra.mxu2 %v2491_v22 }
 0xd83   :  { %882 = vmatpush.msra.mxu2 %v2497_v24 }
 0xd85   :  { %883 = vmatpush.msra.mxu2 %v2503_v26 }
 0xd87   :  { %884 = vmatpush.msra.mxu2 %v2509_v56 }
 0xd89   :  { %885 = vmatpush.msra.mxu2 %v2515_v57 }
 0xd8b   :  { %886 = vmatpush.msra.mxu2 %v2521_v58 }
 0xd8d   :  { %887 = vmatpush.msra.mxu2 %v2547_v32 }
 0xd8f   :  { %888 = vmatpush.msra.mxu2 %v2553_v34 }
 0xd91   :  { %889 = vmatpush.msra.mxu2 %v2559_v62 }
 0xd93   :  { %890 = vmatpush.msra.mxu2 %v2565_v63 }
 0xd95   :  { %891 = vmatpush.msra.mxu2 %v2591_v41 }
 0xd97   :  { %892 = vmatpush.msra.mxu2 %v2617_v43 }
 0xd99   :  { %893 = vmatpush.msra.mxu2 %v2623_v45 }
 0xd9b   :  { %894 = vmatpush.msra.mxu2 %v2629_v47 }
 0xd9d   :  { %895 = vmatpush.msra.mxu2 %v2635_v49 }
 0xd9f   :  { %896 = vmatpush.msra.mxu2 %v2661_v50 }
 0xe03   :  { %v714_v38 = vpop.f32.mrf.mxu2 }
 0xe04   :  { %v717_v39 = vadd.f32 %v714_v38, %v2182_v59 }
 0xe06   :  { %1742 = vtanh.f32 %v717_v39 }
 0xe0c   :  { %v2725_v42 = vpop.eup %1742 }
 0xe0d   :  { %736 = vmatmul.f32.vlgmr.msra.gmra.mxu3 %v2725_v42 }
 0xe0e   :  { %904 = vmatpush.msra.mxu3 %v2491_v22 }
 0xe10   :  { %905 = vmatpush.msra.mxu3 %v2497_v24 }
 0xe12   :  { %906 = vmatpush.msra.mxu3 %v2503_v26 }
 0xe14   :  { %907 = vmatpush.msra.mxu3 %v2509_v56 }
 0xe16   :  { %908 = vmatpush.msra.mxu3 %v2515_v57 }
 0xe18   :  { %909 = vmatpush.msra.mxu3 %v2521_v58 }
 0xe1a   :  { %910 = vmatpush.msra.mxu3 %v2547_v32 }
 0xe1c   :  { %911 = vmatpush.msra.mxu3 %v2553_v34 }
 0xe1e   :  { %912 = vmatpush.msra.mxu3 %v2559_v62 }
 0xe20   :  { %913 = vmatpush.msra.mxu3 %v2565_v63 }
 0xe22   :  { %914 = vmatpush.msra.mxu3 %v2591_v41 }
 0xe24   :  { %915 = vmatpush.msra.mxu3 %v2617_v43 }
 0xe26   :  { %916 = vmatpush.msra.mxu3 %v2623_v45 }
 0xe28   :  { %917 = vmatpush.msra.mxu3 %v2629_v47 }
 0xe2a   :  { %918 = vmatpush.msra.mxu3 %v2635_v49 }
 0xe2c   :  { %919 = vmatpush.msra.mxu3 %v2661_v50 }
 0xe90   :  { %v737_v44 = vpop.f32.mrf.mxu3 }
 0xe91   :  { %v740_v48 = vadd.f32 %v737_v44, %v2182_v59 }
 0xe93   :  { %1744 = vtanh.f32 %v740_v48 }
 0xe99   :  { %v2745_v51 = vpop.eup %1744 }
 0xe9a   :  { %759 = vmatmul.f32.vlgmr.msrb.gmra.mxu0 %v2745_v51 }
 0xe9b   :  { %927 = vmatpush.msrb.mxu0 %v2491_v22 }
 0xe9d   :  { %928 = vmatpush.msrb.mxu0 %v2497_v24 }
 0xe9f   :  { %929 = vmatpush.msrb.mxu0 %v2503_v26 }
 0xea1   :  { %930 = vmatpush.msrb.mxu0 %v2509_v56 }
 0xea3   :  { %931 = vmatpush.msrb.mxu0 %v2515_v57 }
 0xea5   :  { %932 = vmatpush.msrb.mxu0 %v2521_v58 }
 0xea7   :  { %933 = vmatpush.msrb.mxu0 %v2547_v32 }
 0xea9   :  { %934 = vmatpush.msrb.mxu0 %v2553_v34 }
 0xeab   :  { %935 = vmatpush.msrb.mxu0 %v2559_v62 }
 0xead   :  { %936 = vmatpush.msrb.mxu0 %v2565_v63 }
 0xeaf   :  { %937 = vmatpush.msrb.mxu0 %v2591_v41 }
 0xeb1   :  { %938 = vmatpush.msrb.mxu0 %v2617_v43 }
 0xeb3   :  { %939 = vmatpush.msrb.mxu0 %v2623_v45 }
 0xeb5   :  { %940 = vmatpush.msrb.mxu0 %v2629_v47 }
 0xeb7   :  { %941 = vmatpush.msrb.mxu0 %v2635_v49 }
 0xeb9   :  { %942 = vmatpush.msrb.mxu0 %v2661_v50 }
 0xf17   :  { %v760_v53 = vpop.f32.mrf.mxu0 }
 0xf18   :  { %v763_v54 = vadd.f32 %v760_v53, %v2182_v59 }
 0xf1a   :  { %1746 = vtanh.f32 %v763_v54 }
 0xf20   :  { %v2765_v17 = vpop.eup %1746 }
 0xf21   :  { %782 = vmatmul.f32.vlgmr.msrb.gmra.mxu1 %v2765_v17 }
 0xf22   :  { %950 = vmatpush.msrb.mxu1 %v2491_v22 }
 0xf24   :  { %951 = vmatpush.msrb.mxu1 %v2497_v24 }
 0xf26   :  { %952 = vmatpush.msrb.mxu1 %v2503_v26 }
 0xf28   :  { %953 = vmatpush.msrb.mxu1 %v2509_v56 }
 0xf2a   :  { %954 = vmatpush.msrb.mxu1 %v2515_v57 }
 0xf2c   :  { %955 = vmatpush.msrb.mxu1 %v2521_v58 }
 0xf2e   :  { %956 = vmatpush.msrb.mxu1 %v2547_v32 }
 0xf30   :  { %957 = vmatpush.msrb.mxu1 %v2553_v34 }
 0xf32   :  { %958 = vmatpush.msrb.mxu1 %v2559_v62 }
 0xf34   :  { %959 = vmatpush.msrb.mxu1 %v2565_v63 }
 0xf36   :  { %960 = vmatpush.msrb.mxu1 %v2591_v41 }
 0xf38   :  { %961 = vmatpush.msrb.mxu1 %v2617_v43 }
 0xf3a   :  { %962 = vmatpush.msrb.mxu1 %v2623_v45 }
 0xf3c   :  { %963 = vmatpush.msrb.mxu1 %v2629_v47 }
 0xf3e   :  { %964 = vmatpush.msrb.mxu1 %v2635_v49 }
 0xf40   :  { %965 = vmatpush.msrb.mxu1 %v2661_v50 }
 0xf9e   :  { %v783_v18 = vpop.f32.mrf.mxu1 }
 0xf9f   :  { %v786_v60 = vadd.f32 %v783_v18, %v2182_v59 }
 0xfa1   :  { %1748 = vtanh.f32 %v786_v60 }
 0xfa7   :  { %v2785_v28 = vpop.eup %1748 }
 0xfa8   :  { %805 = vmatmul.f32.vlgmr.msrb.gmra.mxu2 %v2785_v28 }
 0xfa9   :  { %973 = vmatpush.msrb.mxu2 %v2491_v22 }
 0xfab   :  { %974 = vmatpush.msrb.mxu2 %v2497_v24 }
 0xfad   :  { %975 = vmatpush.msrb.mxu2 %v2503_v26 }
 0xfaf   :  { %976 = vmatpush.msrb.mxu2 %v2509_v56 }
 0xfb1   :  { %977 = vmatpush.msrb.mxu2 %v2515_v57 }
 0xfb3   :  { %978 = vmatpush.msrb.mxu2 %v2521_v58 }
 0xfb5   :  { %979 = vmatpush.msrb.mxu2 %v2547_v32 }
 0xfb7   :  { %980 = vmatpush.msrb.mxu2 %v2553_v34 }
 0xfb9   :  { %981 = vmatpush.msrb.mxu2 %v2559_v62 }
 0xfbb   :  { %982 = vmatpush.msrb.mxu2 %v2565_v63 }
 0xfbd   :  { %983 = vmatpush.msrb.mxu2 %v2591_v41 }
 0xfbf   :  { %984 = vmatpush.msrb.mxu2 %v2617_v43 }
 0xfc1   :  { %985 = vmatpush.msrb.mxu2 %v2623_v45 }
 0xfc3   :  { %986 = vmatpush.msrb.mxu2 %v2629_v47 }
 0xfc5   :  { %987 = vmatpush.msrb.mxu2 %v2635_v49 }
 0xfc7   :  { %988 = vmatpush.msrb.mxu2 %v2661_v50 }
0x102b   :  { %v806_v1 = vpop.f32.mrf.mxu2 }
0x102c   :  { %v809_v2 = vadd.f32 %v806_v1, %v2182_v59 }
0x102e   :  { %1750 = vtanh.f32 %v809_v2 }
0x1034   :  { %v2805_v5 = vpop.eup %1750 }
0x1035   :  { %828 = vmatmul.f32.vlgmr.msrb.gmra.mxu3 %v2805_v5 }
0x1036   :  { %996 = vmatpush.msrb.mxu3 %v2491_v22 }
0x1038   :  { %997 = vmatpush.msrb.mxu3 %v2497_v24 }
0x103a   :  { %998 = vmatpush.msrb.mxu3 %v2503_v26 }
0x103c   :  { %999 = vmatpush.msrb.mxu3 %v2509_v56 }
0x103e   :  { %1000 = vmatpush.msrb.mxu3 %v2515_v57 }
0x1040   :  { %1001 = vmatpush.msrb.mxu3 %v2521_v58 }
0x1042   :  { %1002 = vmatpush.msrb.mxu3 %v2547_v32 }
0x1044   :  { %1003 = vmatpush.msrb.mxu3 %v2553_v34 }
0x1046   :  { %1004 = vmatpush.msrb.mxu3 %v2559_v62 }
0x1048   :  { %1005 = vmatpush.msrb.mxu3 %v2565_v63 }
0x104a   :  { %1006 = vmatpush.msrb.mxu3 %v2591_v41 }
0x104c   :  { %1007 = vmatpush.msrb.mxu3 %v2617_v43 }
0x104e   :  { %1008 = vmatpush.msrb.mxu3 %v2623_v45 }
0x1050   :  { %1009 = vmatpush.msrb.mxu3 %v2629_v47 }
0x1052   :  { %1010 = vmatpush.msrb.mxu3 %v2635_v49 }
0x1054   :  { %1011 = vmatpush.msrb.mxu3 %v2661_v50 }
0x10b8   :  { %v829_v7 = vpop.f32.mrf.mxu3 }
0x10b9   :  { %v832_v10 = vadd.f32 %v829_v7, %v2182_v59 }
0x10bb   :  { %1752 = vtanh.f32 %v832_v10 }
0x10c1   :  { %v2825_v11 = vpop.eup %1752 }
0x10c2   :  { %851 = vmatmul.f32.vlgmr.msra.gmra.mxu0 %v2825_v11 }
0x10c3   :  { %1019 = vmatpush.msra.mxu0 %v2491_v22 }
0x10c5   :  { %1020 = vmatpush.msra.mxu0 %v2497_v24 }
0x10c7   :  { %1021 = vmatpush.msra.mxu0 %v2503_v26 }
0x10c9   :  { %1022 = vmatpush.msra.mxu0 %v2509_v56 }
0x10cb   :  { %1023 = vmatpush.msra.mxu0 %v2515_v57 }
0x10cd   :  { %1024 = vmatpush.msra.mxu0 %v2521_v58 }
0x10cf   :  { %1025 = vmatpush.msra.mxu0 %v2547_v32 }
0x10d1   :  { %1026 = vmatpush.msra.mxu0 %v2553_v34 }
0x10d3   :  { %1027 = vmatpush.msra.mxu0 %v2559_v62 }
0x10d5   :  { %1028 = vmatpush.msra.mxu0 %v2565_v63 }
0x10d7   :  { %1029 = vmatpush.msra.mxu0 %v2591_v41 }
0x10d9   :  { %1030 = vmatpush.msra.mxu0 %v2617_v43 }
0x10db   :  { %1031 = vmatpush.msra.mxu0 %v2623_v45 }
0x10dd   :  { %1032 = vmatpush.msra.mxu0 %v2629_v47 }
0x10df   :  { %1033 = vmatpush.msra.mxu0 %v2635_v49 }
0x10e1   :  { %1034 = vmatpush.msra.mxu0 %v2661_v50 }
0x113f   :  { %v852_v14 = vpop.f32.mrf.mxu0 }
0x1140   :  { %v855_v16 = vadd.f32 %v852_v14, %v2182_v59 }
0x1142   :  { %1754 = vtanh.f32 %v855_v16 }
0x1148   :  { %v2845_v23 = vpop.eup %1754 }
0x1149   :  { %874 = vmatmul.f32.vlgmr.msra.gmra.mxu1 %v2845_v23 }
0x114a   :  { %1042 = vmatpush.msra.mxu1 %v2491_v22 }
0x114c   :  { %1043 = vmatpush.msra.mxu1 %v2497_v24 }
0x114e   :  { %1044 = vmatpush.msra.mxu1 %v2503_v26 }
0x1150   :  { %1045 = vmatpush.msra.mxu1 %v2509_v56 }
0x1152   :  { %1046 = vmatpush.msra.mxu1 %v2515_v57 }
0x1154   :  { %1047 = vmatpush.msra.mxu1 %v2521_v58 }
0x1156   :  { %1048 = vmatpush.msra.mxu1 %v2547_v32 }
0x1158   :  { %1049 = vmatpush.msra.mxu1 %v2553_v34 }
0x115a   :  { %1050 = vmatpush.msra.mxu1 %v2559_v62 }
0x115c   :  { %1051 = vmatpush.msra.mxu1 %v2565_v63 }
0x115e   :  { %1052 = vmatpush.msra.mxu1 %v2591_v41 }
0x1160   :  { %1053 = vmatpush.msra.mxu1 %v2617_v43 }
0x1162   :  { %1054 = vmatpush.msra.mxu1 %v2623_v45 }
0x1164   :  { %1055 = vmatpush.msra.mxu1 %v2629_v47 }
0x1166   :  { %1056 = vmatpush.msra.mxu1 %v2635_v49 }
0x1168   :  { %1057 = vmatpush.msra.mxu1 %v2661_v50 }
0x11c6   :  { %v875_v25 = vpop.f32.mrf.mxu1 }
0x11c7   :  { %v878_v31 = vadd.f32 %v875_v25, %v2182_v59 }
0x11c9   :  { %1756 = vtanh.f32 %v878_v31  ;;  %v1240_v31 = vld [vmem:[%s3589_s8 + $0x80] sm:$0xff] }
0x11cf   :  { %v2865_v35 = vpop.eup %1756 }
0x11d0   :  { %897 = vmatmul.f32.vlgmr.msra.gmra.mxu2 %v2865_v35 }
0x11d1   :  { %1065 = vmatpush.msra.mxu2 %v2491_v22 }
0x11d3   :  { %1066 = vmatpush.msra.mxu2 %v2497_v24 }
0x11d5   :  { %1067 = vmatpush.msra.mxu2 %v2503_v26 }
0x11d7   :  { %1068 = vmatpush.msra.mxu2 %v2509_v56 }
0x11d9   :  { %1069 = vmatpush.msra.mxu2 %v2515_v57 }
0x11db   :  { %1070 = vmatpush.msra.mxu2 %v2521_v58 }
0x11dd   :  { %1071 = vmatpush.msra.mxu2 %v2547_v32 }
0x11df   :  { %1072 = vmatpush.msra.mxu2 %v2553_v34 }
0x11e1   :  { %1073 = vmatpush.msra.mxu2 %v2559_v62 }
0x11e3   :  { %1074 = vmatpush.msra.mxu2 %v2565_v63 }
0x11e5   :  { %1075 = vmatpush.msra.mxu2 %v2591_v41 }
0x11e7   :  { %1076 = vmatpush.msra.mxu2 %v2617_v43 }
0x11e9   :  { %1077 = vmatpush.msra.mxu2 %v2623_v45 }
0x11eb   :  { %1078 = vmatpush.msra.mxu2 %v2629_v47 }
0x11ed   :  { %1079 = vmatpush.msra.mxu2 %v2635_v49 }
0x11ef   :  { %1080 = vmatpush.msra.mxu2 %v2661_v50 }
0x1253   :  { %v898_v38 = vpop.f32.mrf.mxu2 }
0x1254   :  { %v901_v39 = vadd.f32 %v898_v38, %v2182_v59  ;;  %v1238_v38 = vld [vmem:[%s3589_s8 + $0x70] sm:$0xff] }
0x1256   :  { %1758 = vtanh.f32 %v901_v39  ;;  %v1236_v39 = vld [vmem:[%s3589_s8 + $0x60] sm:$0xff] }
0x125c   :  { %v2885_v44 = vpop.eup %1758 }
0x125d   :  { %920 = vmatmul.f32.vlgmr.msra.gmra.mxu3 %v2885_v44 }
0x125e   :  { %1088 = vmatpush.msra.mxu3 %v2491_v22 }
0x1260   :  { %1089 = vmatpush.msra.mxu3 %v2497_v24 }
0x1262   :  { %1090 = vmatpush.msra.mxu3 %v2503_v26 }
0x1264   :  { %1091 = vmatpush.msra.mxu3 %v2509_v56 }
0x1266   :  { %1092 = vmatpush.msra.mxu3 %v2515_v57 }
0x1268   :  { %1093 = vmatpush.msra.mxu3 %v2521_v58 }
0x126a   :  { %1094 = vmatpush.msra.mxu3 %v2547_v32 }
0x126c   :  { %1095 = vmatpush.msra.mxu3 %v2553_v34 }
0x126e   :  { %1096 = vmatpush.msra.mxu3 %v2559_v62 }
0x1270   :  { %1097 = vmatpush.msra.mxu3 %v2565_v63 }
0x1272   :  { %1098 = vmatpush.msra.mxu3 %v2591_v41 }
0x1274   :  { %1099 = vmatpush.msra.mxu3 %v2617_v43 }
0x1276   :  { %1100 = vmatpush.msra.mxu3 %v2623_v45 }
0x1278   :  { %1101 = vmatpush.msra.mxu3 %v2629_v47 }
0x127a   :  { %1102 = vmatpush.msra.mxu3 %v2635_v49 }
0x127c   :  { %1103 = vmatpush.msra.mxu3 %v2661_v50 }
0x12e0   :  { %v921_v48 = vpop.f32.mrf.mxu3 }
0x12e1   :  { %v924_v53 = vadd.f32 %v921_v48, %v2182_v59  ;;  %v1234_v48 = vld [vmem:[%s3589_s8 + $0x50] sm:$0xff] }
0x12e3   :  { %1760 = vtanh.f32 %v924_v53  ;;  %v1232_v53 = vld [vmem:[%s3589_s8 + $0x40] sm:$0xff] }
0x12e9   :  { %v2905_v54 = vpop.eup %1760 }
0x12ea   :  { %943 = vmatmul.f32.vlgmr.msrb.gmra.mxu0 %v2905_v54 }
0x12eb   :  { %1111 = vmatpush.msrb.mxu0 %v2491_v22 }
0x12ed   :  { %1112 = vmatpush.msrb.mxu0 %v2497_v24 }
0x12ef   :  { %1113 = vmatpush.msrb.mxu0 %v2503_v26 }
0x12f1   :  { %1114 = vmatpush.msrb.mxu0 %v2509_v56 }
0x12f3   :  { %1115 = vmatpush.msrb.mxu0 %v2515_v57 }
0x12f5   :  { %1116 = vmatpush.msrb.mxu0 %v2521_v58 }
0x12f7   :  { %1117 = vmatpush.msrb.mxu0 %v2547_v32 }
0x12f9   :  { %1118 = vmatpush.msrb.mxu0 %v2553_v34 }
0x12fb   :  { %1119 = vmatpush.msrb.mxu0 %v2559_v62 }
0x12fd   :  { %1120 = vmatpush.msrb.mxu0 %v2565_v63 }
0x12ff   :  { %1121 = vmatpush.msrb.mxu0 %v2591_v41 }
0x1301   :  { %1122 = vmatpush.msrb.mxu0 %v2617_v43 }
0x1303   :  { %1123 = vmatpush.msrb.mxu0 %v2623_v45 }
0x1305   :  { %1124 = vmatpush.msrb.mxu0 %v2629_v47 }
0x1307   :  { %1125 = vmatpush.msrb.mxu0 %v2635_v49 }
0x1309   :  { %1126 = vmatpush.msrb.mxu0 %v2661_v50 }
0x1367   :  { %v944_v18 = vpop.f32.mrf.mxu0 }
0x1368   :  { %v947_v60 = vadd.f32 %v944_v18, %v2182_v59  ;;  %v1230_v18 = vld [vmem:[%s3589_s8 + $0x30] sm:$0xff] }
0x136a   :  { %1762 = vtanh.f32 %v947_v60  ;;  %v1228_v60 = vld [vmem:[%s3589_s8 + $0x20] sm:$0xff] }
0x1370   :  { %v2925_v1 = vpop.eup %1762 }
0x1371   :  { %966 = vmatmul.f32.vlgmr.msrb.gmra.mxu1 %v2925_v1 }
0x1372   :  { %1134 = vmatpush.msrb.mxu1 %v2491_v22 }
0x1374   :  { %1135 = vmatpush.msrb.mxu1 %v2497_v24 }
0x1376   :  { %1136 = vmatpush.msrb.mxu1 %v2503_v26 }
0x1378   :  { %1137 = vmatpush.msrb.mxu1 %v2509_v56 }
0x137a   :  { %1138 = vmatpush.msrb.mxu1 %v2515_v57 }
0x137c   :  { %1139 = vmatpush.msrb.mxu1 %v2521_v58 }
0x137e   :  { %1140 = vmatpush.msrb.mxu1 %v2547_v32 }
0x1380   :  { %1141 = vmatpush.msrb.mxu1 %v2553_v34 }
0x1382   :  { %1142 = vmatpush.msrb.mxu1 %v2559_v62 }
0x1384   :  { %1143 = vmatpush.msrb.mxu1 %v2565_v63 }
0x1386   :  { %1144 = vmatpush.msrb.mxu1 %v2591_v41 }
0x1388   :  { %1145 = vmatpush.msrb.mxu1 %v2617_v43 }
0x138a   :  { %1146 = vmatpush.msrb.mxu1 %v2623_v45 }
0x138c   :  { %1147 = vmatpush.msrb.mxu1 %v2629_v47 }
0x138e   :  { %1148 = vmatpush.msrb.mxu1 %v2635_v49 }
0x1390   :  { %1149 = vmatpush.msrb.mxu1 %v2661_v50 }
0x13ee   :  { %v967_v2 = vpop.f32.mrf.mxu1 }
0x13ef   :  { %v970_v7 = vadd.f32 %v967_v2, %v2182_v59  ;;  %v1226_v2 = vld [vmem:[%s3589_s8 + $0x10] sm:$0xff] }
0x13f1   :  { %1764 = vtanh.f32 %v970_v7  ;;  %v1224_v7 = vld [vmem:[%s3589_s8] sm:$0xff] }
0x13f7   :  { %v2945_v10 = vpop.eup %1764 }
0x13f8   :  { %989 = vmatmul.f32.vlgmr.msrb.gmra.mxu2 %v2945_v10 }
0x13f9   :  { %1157 = vmatpush.msrb.mxu2 %v2491_v22 }
0x13fb   :  { %1158 = vmatpush.msrb.mxu2 %v2497_v24 }
0x13fd   :  { %1159 = vmatpush.msrb.mxu2 %v2503_v26 }
0x13ff   :  { %1160 = vmatpush.msrb.mxu2 %v2509_v56 }
0x1401   :  { %1161 = vmatpush.msrb.mxu2 %v2515_v57 }
0x1403   :  { %1162 = vmatpush.msrb.mxu2 %v2521_v58 }
0x1405   :  { %1163 = vmatpush.msrb.mxu2 %v2547_v32 }
0x1407   :  { %1164 = vmatpush.msrb.mxu2 %v2553_v34 }
0x1409   :  { %1165 = vmatpush.msrb.mxu2 %v2559_v62 }
0x140b   :  { %1166 = vmatpush.msrb.mxu2 %v2565_v63  ;;  %v1254_v63 = vld [vmem:[%s3589_s8 + $0xf0] sm:$0xff] }
0x140d   :  { %1167 = vmatpush.msrb.mxu2 %v2591_v41  ;;  %v1252_v41 = vld [vmem:[%s3589_s8 + $0xe0] sm:$0xff] }
0x140f   :  { %1168 = vmatpush.msrb.mxu2 %v2617_v43  ;;  %v1250_v43 = vld [vmem:[%s3589_s8 + $0xd0] sm:$0xff] }
0x1411   :  { %1169 = vmatpush.msrb.mxu2 %v2623_v45  ;;  %v1248_v45 = vld [vmem:[%s3589_s8 + $0xc0] sm:$0xff] }
0x1413   :  { %1170 = vmatpush.msrb.mxu2 %v2629_v47  ;;  %v1246_v47 = vld [vmem:[%s3589_s8 + $0xb0] sm:$0xff] }
0x1415   :  { %1171 = vmatpush.msrb.mxu2 %v2635_v49  ;;  %v1244_v49 = vld [vmem:[%s3589_s8 + $0xa0] sm:$0xff] }
0x1417   :  { %1172 = vmatpush.msrb.mxu2 %v2661_v50  ;;  %v1242_v50 = vld [vmem:[%s3589_s8 + $0x90] sm:$0xff] }
0x147b   :  { %v990_v22 = vpop.f32.mrf.mxu2 }
0x147c   :  { %v993_v24 = vadd.f32 %v990_v22, %v2182_v59 }
0x147e   :  { %1766 = vtanh.f32 %v993_v24 }
0x1484   :  { %v2965_v26 = vpop.eup %1766 }
0x1485   :  { %1012 = vmatmul.f32.vlgmr.msrb.gmra.mxu3 %v2965_v26 }
0x1486   :  { %1656 = vmatpush.msrb.mxu3 %v1254_v63 }
0x1488   :  { %1657 = vmatpush.msrb.mxu3 %v1252_v41 }
0x148a   :  { %1658 = vmatpush.msrb.mxu3 %v1250_v43 }
0x148c   :  { %1659 = vmatpush.msrb.mxu3 %v1248_v45 }
0x148e   :  { %1660 = vmatpush.msrb.mxu3 %v1246_v47 }
0x1490   :  { %1661 = vmatpush.msrb.mxu3 %v1244_v49 }
0x1492   :  { %1662 = vmatpush.msrb.mxu3 %v1242_v50 }
0x1494   :  { %1663 = vmatpush.msrb.mxu3 %v1240_v31 }
0x1496   :  { %1664 = vmatpush.msrb.mxu3 %v1238_v38 }
0x1498   :  { %1665 = vmatpush.msrb.mxu3 %v1236_v39 }
0x149a   :  { %1666 = vmatpush.msrb.mxu3 %v1234_v48 }
0x149c   :  { %1667 = vmatpush.msrb.mxu3 %v1232_v53 }
0x149e   :  { %1668 = vmatpush.msrb.mxu3 %v1230_v18 }
0x14a0   :  { %1669 = vmatpush.msrb.mxu3 %v1228_v60 }
0x14a2   :  { %1670 = vmatpush.msrb.mxu3 %v1226_v2 }
0x14a4   :  { %1671 = vmatpush.msrb.mxu3 %v1224_v7 }
0x1508   :  { %v1013_v56 = vpop.f32.mrf.mxu3 }
0x1509   :  { %v1016_v57 = vadd.f32 %v1013_v56, %v2182_v59 }
0x150b   :  { %1768 = vtanh.f32 %v1016_v57  ;;  %v1255_v57 = vld [vmem:[%s3589_s8 + $0xf8] sm:$0xff] }
0x1511   :  { %v2969_v58 = vpop.eup %1768 }
0x1512   :  { %1035 = vmatmul.f32.vlgmr.msra.gmra.mxu0 %v2969_v58 }
0x1513   :  { %1411 = vmatpush.msra.mxu0 %v1255_v57 }
0x158f   :  { %v1036_v32 = vpop.f32.mrf.mxu0 }
0x1590   :  { %v1039_v34 = vadd.f32 %v1036_v32, %v2182_v59  ;;  %v1253_v32 = vld [vmem:[%s3589_s8 + $0xe8] sm:$0xff] }
0x1591   :  { %1412 = vmatpush.msra.mxu0 %v1253_v32 }
0x1592   :  { %1770 = vtanh.f32 %v1039_v34  ;;  %v1251_v34 = vld [vmem:[%s3589_s8 + $0xd8] sm:$0xff] }
0x1593   :  { %1413 = vmatpush.msra.mxu0 %v1251_v34 }
0x1598   :  { %v2973_v62 = vpop.eup %1770 }
0x1599   :  { %1058 = vmatmul.f32.vlgmr.msra.gmra.mxu1 %v2973_v62 }
0x159a   :  { %1672 = vmatpush.msra.mxu1 %v1255_v57 }
0x159c   :  { %1673 = vmatpush.msra.mxu1 %v1253_v32 }
0x159e   :  { %1674 = vmatpush.msra.mxu1 %v1251_v34 }
0x1616   :  { %v1059_v14 = vpop.f32.mrf.mxu1 }
0x1617   :  { %v1062_v16 = vadd.f32 %v1059_v14, %v2182_v59  ;;  %v1235_v14 = vld [vmem:[%s3589_s8 + $0x58] sm:$0xff] }
0x1619   :  { %1772 = vtanh.f32 %v1062_v16  ;;  %v1233_v16 = vld [vmem:[%s3589_s8 + $0x48] sm:$0xff] }
0x161f   :  { %v2998_v25 = vpop.eup %1772 }
0x1620   :  { %1081 = vmatmul.f32.vlgmr.msra.gmra.mxu2 %v2998_v25 }
0x1621   :  { %1262 = vmatpush.msra.mxu2 %v1254_v63  ;;  %v1249_v63 = vld [vmem:[%s3589_s8 + $0xc8] sm:$0xff] }
0x1622   :  { %1414 = vmatpush.msra.mxu0 %v1249_v63  ;;  %1675 = vmatpush.msra.mxu1 %v1249_v63 }
0x1623   :  { %1263 = vmatpush.msra.mxu2 %v1252_v41  ;;  %v1247_v41 = vld [vmem:[%s3589_s8 + $0xb8] sm:$0xff] }
0x1624   :  { %1415 = vmatpush.msra.mxu0 %v1247_v41  ;;  %1676 = vmatpush.msra.mxu1 %v1247_v41 }
0x1625   :  { %1264 = vmatpush.msra.mxu2 %v1250_v43  ;;  %v1245_v43 = vld [vmem:[%s3589_s8 + $0xa8] sm:$0xff] }
0x1626   :  { %1416 = vmatpush.msra.mxu0 %v1245_v43  ;;  %1677 = vmatpush.msra.mxu1 %v1245_v43 }
0x1627   :  { %1265 = vmatpush.msra.mxu2 %v1248_v45  ;;  %v1243_v45 = vld [vmem:[%s3589_s8 + $0x98] sm:$0xff] }
0x1628   :  { %1417 = vmatpush.msra.mxu0 %v1243_v45  ;;  %1678 = vmatpush.msra.mxu1 %v1243_v45 }
0x1629   :  { %1266 = vmatpush.msra.mxu2 %v1246_v47  ;;  %v1241_v47 = vld [vmem:[%s3589_s8 + $0x88] sm:$0xff] }
0x162a   :  { %1418 = vmatpush.msra.mxu0 %v1241_v47  ;;  %1679 = vmatpush.msra.mxu1 %v1241_v47 }
0x162b   :  { %1267 = vmatpush.msra.mxu2 %v1244_v49  ;;  %v1239_v49 = vld [vmem:[%s3589_s8 + $0x78] sm:$0xff] }
0x162c   :  { %1419 = vmatpush.msra.mxu0 %v1239_v49  ;;  %1680 = vmatpush.msra.mxu1 %v1239_v49 }
0x162d   :  { %1268 = vmatpush.msra.mxu2 %v1242_v50  ;;  %v1237_v50 = vld [vmem:[%s3589_s8 + $0x68] sm:$0xff] }
0x162e   :  { %1420 = vmatpush.msra.mxu0 %v1237_v50  ;;  %1681 = vmatpush.msra.mxu1 %v1237_v50 }
0x162f   :  { %1269 = vmatpush.msra.mxu2 %v1240_v31  ;;  %v1231_v31 = vld [vmem:[%s3589_s8 + $0x38] sm:$0xff] }
0x1630   :  { %1421 = vmatpush.msra.mxu0 %v1235_v14  ;;  %1682 = vmatpush.msra.mxu1 %v1235_v14 }
0x1631   :  { %1270 = vmatpush.msra.mxu2 %v1238_v38  ;;  %v1229_v38 = vld [vmem:[%s3589_s8 + $0x28] sm:$0xff] }
0x1632   :  { %1422 = vmatpush.msra.mxu0 %v1233_v16  ;;  %1683 = vmatpush.msra.mxu1 %v1233_v16 }
0x1633   :  { %1271 = vmatpush.msra.mxu2 %v1236_v39  ;;  %v1227_v39 = vld [vmem:[%s3589_s8 + $0x18] sm:$0xff] }
0x1634   :  { %1423 = vmatpush.msra.mxu0 %v1231_v31  ;;  %1684 = vmatpush.msra.mxu1 %v1231_v31 }
0x1635   :  { %1272 = vmatpush.msra.mxu2 %v1234_v48  ;;  %v1225_v48 = vld [vmem:[%s3589_s8 + $0x8] sm:$0xff] }
0x1636   :  { %1424 = vmatpush.msra.mxu0 %v1229_v38  ;;  %1685 = vmatpush.msra.mxu1 %v1229_v38 }
0x1637   :  { %1273 = vmatpush.msra.mxu2 %v1232_v53 }
0x1638   :  { %1425 = vmatpush.msra.mxu0 %v1227_v39  ;;  %1686 = vmatpush.msra.mxu1 %v1227_v39 }
0x1639   :  { %1274 = vmatpush.msra.mxu2 %v1230_v18 }
0x163a   :  { %1426 = vmatpush.msra.mxu0 %v1225_v48  ;;  %1687 = vmatpush.msra.mxu1 %v1225_v48 }
0x163b   :  { %1275 = vmatpush.msra.mxu2 %v1228_v60  ;;  %v3100_v60 = vld [vmem:[%s3590_s9] sm:$0x3] }
0x163d   :  { %1276 = vmatpush.msra.mxu2 %v1226_v2  ;;  %v3104_v2 = vperm.slane %v3100_v60, 0 }
0x163f   :  { %1277 = vmatpush.msra.mxu2 %v1224_v7 }
0x16a3   :  { %v1082_v22 = vpop.f32.mrf.mxu2 }
0x16a4   :  { %v1085_v24 = vadd.f32 %v1082_v22, %v2182_v59 }
0x16a6   :  { %1774 = vtanh.f32 %v1085_v24 }
0x16ac   :  { %v3029_v56 = vpop.eup %1774 }
0x16ad   :  { %1104 = vmatmul.f32.vlgmr.msra.gmra.mxu3 %v3029_v56 }
0x16b5   :  { %1338 = vmatmul.f32.vlgmr.msrb.gmra.mxu3 %v2665_v19 }
0x16bd   :  { %1341 = vmatmul.f32.gmra.mxu3 %v2685_v29 }
0x16c5   :  { %1344 = vmatmul.f32.gmra.mxu3 %v2705_v36 }
0x16cd   :  { %1347 = vmatmul.f32.gmra.mxu3 %v2725_v42 }
0x16d5   :  { %1350 = vmatmul.f32.gmra.mxu3 %v2745_v51 }
0x16dd   :  { %1353 = vmatmul.f32.gmra.mxu3 %v2765_v17 }
0x16e5   :  { %1356 = vmatmul.f32.gmra.mxu3 %v2785_v28 }
0x16ed   :  { %1359 = vmatmul.f32.gmra.mxu3 %v2805_v5 }
0x16f5   :  { %1362 = vmatmul.f32.gmra.mxu3 %v2825_v11 }
0x16fd   :  { %1365 = vmatmul.f32.gmra.mxu3 %v2845_v23 }
0x1705   :  { %1368 = vmatmul.f32.gmra.mxu3 %v2865_v35 }
0x170d   :  { %1371 = vmatmul.f32.gmra.mxu3 %v2885_v44 }
0x1715   :  { %1374 = vmatmul.f32.gmra.mxu3 %v2905_v54 }
0x171d   :  { %1377 = vmatmul.f32.gmra.mxu3 %v2925_v1 }
0x1725   :  { %1380 = vmatmul.f32.gmra.mxu3 %v2945_v10 }
0x172d   :  { %1383 = vmatmul.f32.gmra.mxu3 %v2965_v26 }
0x1730   :  { %v1105_v53 = vpop.f32.mrf.mxu3 }
0x1731   :  { %v1108_v18 = vadd.f32 %v1105_v53, %v2182_v59 }
0x1733   :  { %1776 = vtanh.f32 %v1108_v18 }
0x1735   :  { %1386 = vmatmul.f32.gmra.mxu3 %v2969_v58 }
0x1738   :  { %v1339_v7 = vpop.f32.mrf.mxu3 }
0x1739   :  { %v3106_v22 = vpop.eup %1776  ;;  %v1340_v24 = vadd.f32 %v1339_v7, %v3104_v2 }
0x173a   :  { %1127 = vmatmul.f32.vlgmr.msrb.gmra.mxu0 %v3106_v22 }
0x173b   :  { %1601 = vst [vmem:[%s3591_s10 + $0x140] sm:$0xff] %v1340_v24 }
0x173d   :  { %1389 = vmatmul.f32.gmra.mxu3 %v2973_v62 }
0x1740   :  { %v1342_v57 = vpop.f32.mrf.mxu3 }
0x1741   :  { %v1343_v32 = vadd.f32 %v1342_v57, %v3104_v2 }
0x1742   :  { %1427 = vmatmul.f32.vlgmr.msra.gmra.mxu0 %v2185_v61 }
0x1743   :  { %1603 = vst [vmem:[%s3591_s10 + $0x150] sm:$0xff] %v1343_v32 }
0x1745   :  { %1392 = vmatmul.f32.gmra.mxu3 %v2998_v25 }
0x1748   :  { %v1345_v34 = vpop.f32.mrf.mxu3 }
0x1749   :  { %v1346_v63 = vadd.f32 %v1345_v34, %v3104_v2 }
0x174a   :  { %1430 = vmatmul.f32.gmra.mxu0 %v2205_v0 }
0x174b   :  { %1605 = vst [vmem:[%s3591_s10 + $0x160] sm:$0xff] %v1346_v63 }
0x174d   :  { %1395 = vmatmul.f32.gmra.mxu3 %v3029_v56 }
0x1750   :  { %v1348_v41 = vpop.f32.mrf.mxu3 }
0x1751   :  { %v1349_v43 = vadd.f32 %v1348_v41, %v3104_v2 }
0x1752   :  { %1433 = vmatmul.f32.gmra.mxu0 %v2225_v3 }
0x1753   :  { %1607 = vst [vmem:[%s3591_s10 + $0x170] sm:$0xff] %v1349_v43 }
0x1755   :  { %1398 = vmatmul.f32.gmra.mxu3 %v3106_v22 }
0x1758   :  { %v1351_v45 = vpop.f32.mrf.mxu3 }
0x1759   :  { %v1352_v47 = vadd.f32 %v1351_v45, %v3104_v2 }
0x175a   :  { %1436 = vmatmul.f32.gmra.mxu0 %v2245_v6 }
0x175b   :  { %1609 = vst [vmem:[%s3591_s10 + $0x180] sm:$0xff] %v1352_v47 }
0x1760   :  { %v1354_v49 = vpop.f32.mrf.mxu3 }
0x1761   :  { %v1355_v50 = vadd.f32 %v1354_v49, %v3104_v2 }
0x1762   :  { %1439 = vmatmul.f32.gmra.mxu0 %v2265_v9 }
0x1763   :  { %1611 = vst [vmem:[%s3591_s10 + $0x190] sm:$0xff] %v1355_v50 }
0x1768   :  { %v1357_v14 = vpop.f32.mrf.mxu3 }
0x1769   :  { %v1358_v16 = vadd.f32 %v1357_v14, %v3104_v2 }
0x176a   :  { %1442 = vmatmul.f32.gmra.mxu0 %v2285_v12 }
0x176b   :  { %1613 = vst [vmem:[%s3591_s10 + $0x1a0] sm:$0xff] %v1358_v16 }
0x1770   :  { %v1360_v31 = vpop.f32.mrf.mxu3 }
0x1771   :  { %v1361_v38 = vadd.f32 %v1360_v31, %v3104_v2 }
0x1772   :  { %1445 = vmatmul.f32.gmra.mxu0 %v2305_v15 }
0x1773   :  { %1615 = vst [vmem:[%s3591_s10 + $0x1b0] sm:$0xff] %v1361_v38 }
0x1778   :  { %v1363_v39 = vpop.f32.mrf.mxu3 }
0x1779   :  { %v1364_v48 = vadd.f32 %v1363_v39, %v3104_v2  ;;  %v3199_v39 = vperm.slane %v3100_v60, 1 }
0x177a   :  { %1448 = vmatmul.f32.gmra.mxu0 %v2325_v21 }
0x177b   :  { %1617 = vst [vmem:[%s3591_s10 + $0x1c0] sm:$0xff] %v1364_v48 }
0x1780   :  { %v1366_v53 = vpop.f32.mrf.mxu3 }
0x1781   :  { %v1367_v18 = vadd.f32 %v1366_v53, %v3104_v2 }
0x1782   :  { %1451 = vmatmul.f32.gmra.mxu0 %v2345_v27 }
0x1783   :  { %1619 = vst [vmem:[%s3591_s10 + $0x1d0] sm:$0xff] %v1367_v18 }
0x1788   :  { %v1369_v7 = vpop.f32.mrf.mxu3 }
0x1789   :  { %v1370_v24 = vadd.f32 %v1369_v7, %v3104_v2 }
0x178a   :  { %1454 = vmatmul.f32.gmra.mxu0 %v2365_v33 }
0x178b   :  { %1621 = vst [vmem:[%s3591_s10 + $0x1e0] sm:$0xff] %v1370_v24 }
0x1790   :  { %v1372_v57 = vpop.f32.mrf.mxu3 }
0x1791   :  { %v1373_v32 = vadd.f32 %v1372_v57, %v3104_v2 }
0x1792   :  { %1457 = vmatmul.f32.gmra.mxu0 %v2385_v37 }
0x1793   :  { %1623 = vst [vmem:[%s3591_s10 + $0x1f0] sm:$0xff] %v1373_v32 }
0x1798   :  { %v1375_v34 = vpop.f32.mrf.mxu3 }
0x1799   :  { %v1376_v63 = vadd.f32 %v1375_v34, %v3104_v2 }
0x179a   :  { %1460 = vmatmul.f32.gmra.mxu0 %v2405_v40 }
0x179b   :  { %1625 = vst [vmem:[%s3591_s10 + $0x200] sm:$0xff] %v1376_v63 }
0x17a0   :  { %v1378_v41 = vpop.f32.mrf.mxu3 }
0x17a1   :  { %v1379_v43 = vadd.f32 %v1378_v41, %v3104_v2 }
0x17a2   :  { %1463 = vmatmul.f32.gmra.mxu0 %v2425_v46 }
0x17a3   :  { %1627 = vst [vmem:[%s3591_s10 + $0x210] sm:$0xff] %v1379_v43 }
0x17a8   :  { %v1381_v45 = vpop.f32.mrf.mxu3 }
0x17a9   :  { %v1382_v47 = vadd.f32 %v1381_v45, %v3104_v2 }
0x17aa   :  { %1466 = vmatmul.f32.gmra.mxu0 %v2445_v52 }
0x17ab   :  { %1629 = vst [vmem:[%s3591_s10 + $0x220] sm:$0xff] %v1382_v47 }
0x17b0   :  { %v1384_v49 = vpop.f32.mrf.mxu3 }
0x17b1   :  { %v1385_v50 = vadd.f32 %v1384_v49, %v3104_v2 }
0x17b2   :  { %1469 = vmatmul.f32.gmra.mxu0 %v2465_v55 }
0x17b3   :  { %1631 = vst [vmem:[%s3591_s10 + $0x230] sm:$0xff] %v1385_v50 }
0x17b7   :  { %v1128_v14 = vpop.f32.mrf.mxu0 }
0x17b8   :  { %v1131_v16 = vadd.f32 %v1128_v14, %v2182_v59  ;;  %v1387_v31 = vpop.f32.mrf.mxu3 }
0x17b9   :  { %v1388_v38 = vadd.f32 %v1387_v31, %v3104_v2 }
0x17ba   :  { %1778 = vtanh.f32 %v1131_v16  ;;  %1472 = vmatmul.f32.gmra.mxu0 %v2485_v20 }
0x17bb   :  { %1633 = vst [vmem:[%s3591_s10 + $0x240] sm:$0xff] %v1388_v38 }
0x17bf   :  { %v1428_v48 = vpop.f32.mrf.mxu0 }
0x17c0   :  { %v3201_v53 = vpop.eup %1778  ;;  %v1429_v18 = vadd.f32 %v1428_v48, %v3199_v39  ;;  %v1390_v7 = vpop.f32.mrf.mxu3 }
0x17c1   :  { %v1391_v24 = vadd.f32 %v1390_v7, %v3104_v2  ;;  %1150 = vmatmul.f32.vlgmr.msrb.gmra.mxu1 %v3201_v53  ;;  %1401 = vmatmul.f32.gmra.mxu3 %v3201_v53 }
0x17c2   :  { %1562 = vst.msk [vmem:[%s3591_s10 + $0x8] sm:$0xff] %vm1561_vm3, %v1429_v18  ;;  %1475 = vmatmul.f32.gmra.mxu0 %v2535_v30 }
0x17c3   :  { %1635 = vst [vmem:[%s3591_s10 + $0x250] sm:$0xff] %v1391_v24 }
0x17c7   :  { %v1431_v60 = vpop.f32.mrf.mxu0 }
0x17c8   :  { %v1432_v57 = vadd.f32 %v1431_v60, %v3199_v39  ;;  %v1393_v32 = vpop.f32.mrf.mxu3 }
0x17c9   :  { %v1394_v34 = vadd.f32 %v1393_v32, %v3104_v2  ;;  %1493 = vmatmul.f32.vlgmr.msra.gmra.mxu1 %v2705_v36 }
0x17ca   :  { %1564 = vst.msk [vmem:[%s3591_s10 + $0x18] sm:$0xff] %vm1561_vm3, %v1432_v57  ;;  %1478 = vmatmul.f32.gmra.mxu0 %v2575_v4 }
0x17cb   :  { %1637 = vst [vmem:[%s3591_s10 + $0x260] sm:$0xff] %v1394_v34 }
0x17cf   :  { %v1434_v63 = vpop.f32.mrf.mxu0 }
0x17d0   :  { %v1435_v41 = vadd.f32 %v1434_v63, %v3199_v39  ;;  %v1396_v43 = vpop.f32.mrf.mxu3 }
0x17d1   :  { %v1397_v45 = vadd.f32 %v1396_v43, %v3104_v2  ;;  %1496 = vmatmul.f32.gmra.mxu1 %v2725_v42 }
0x17d2   :  { %1566 = vst.msk [vmem:[%s3591_s10 + $0x28] sm:$0xff] %vm1561_vm3, %v1435_v41  ;;  %1481 = vmatmul.f32.gmra.mxu0 %v2600_v8 }
0x17d3   :  { %1639 = vst [vmem:[%s3591_s10 + $0x270] sm:$0xff] %v1397_v45 }
0x17d7   :  { %v1437_v36 = vpop.f32.mrf.mxu0 }
0x17d8   :  { %v1438_v47 = vadd.f32 %v1437_v36, %v3199_v39  ;;  %v1399_v49 = vpop.f32.mrf.mxu3 }
0x17d9   :  { %v1400_v50 = vadd.f32 %v1399_v49, %v3104_v2  ;;  %1499 = vmatmul.f32.gmra.mxu1 %v2745_v51 }
0x17da   :  { %1568 = vst.msk [vmem:[%s3591_s10 + $0x38] sm:$0xff] %vm1561_vm3, %v1438_v47  ;;  %1484 = vmatmul.f32.gmra.mxu0 %v2640_v13 }
0x17db   :  { %1641 = vst [vmem:[%s3591_s10 + $0x280] sm:$0xff] %v1400_v50 }
0x17df   :  { %v1440_v42 = vpop.f32.mrf.mxu0 }
0x17e0   :  { %v1441_v14 = vadd.f32 %v1440_v42, %v3199_v39 }
0x17e1   :  { %1502 = vmatmul.f32.gmra.mxu1 %v2765_v17 }
0x17e2   :  { %1570 = vst.msk [vmem:[%s3591_s10 + $0x48] sm:$0xff] %vm1561_vm3, %v1441_v14  ;;  %1487 = vmatmul.f32.gmra.mxu0 %v2665_v19 }
0x17e7   :  { %v1443_v51 = vpop.f32.mrf.mxu0 }
0x17e8   :  { %v1444_v16 = vadd.f32 %v1443_v51, %v3199_v39 }
0x17e9   :  { %1505 = vmatmul.f32.gmra.mxu1 %v2785_v28 }
0x17ea   :  { %1572 = vst.msk [vmem:[%s3591_s10 + $0x58] sm:$0xff] %vm1561_vm3, %v1444_v16  ;;  %1490 = vmatmul.f32.gmra.mxu0 %v2685_v29 }
0x17ef   :  { %v1446_v17 = vpop.f32.mrf.mxu0 }
0x17f0   :  { %v1447_v31 = vadd.f32 %v1446_v17, %v3199_v39 }
0x17f1   :  { %1508 = vmatmul.f32.gmra.mxu1 %v2805_v5 }
0x17f2   :  { %1574 = vst.msk [vmem:[%s3591_s10 + $0x68] sm:$0xff] %vm1561_vm3, %v1447_v31 }
0x17f7   :  { %v1449_v19 = vpop.f32.mrf.mxu0 }
0x17f8   :  { %v1450_v28 = vadd.f32 %v1449_v19, %v3199_v39 }
0x17f9   :  { %1511 = vmatmul.f32.gmra.mxu1 %v2825_v11 }
0x17fa   :  { %1576 = vst.msk [vmem:[%s3591_s10 + $0x78] sm:$0xff] %vm1561_vm3, %v1450_v28 }
0x17ff   :  { %v1452_v29 = vpop.f32.mrf.mxu0 }
0x1800   :  { %v1453_v38 = vadd.f32 %v1452_v29, %v3199_v39 }
0x1801   :  { %1514 = vmatmul.f32.gmra.mxu1 %v2845_v23 }
0x1802   :  { %1578 = vst.msk [vmem:[%s3591_s10 + $0x88] sm:$0xff] %vm1561_vm3, %v1453_v38 }
0x1807   :  { %v1455_v5 = vpop.f32.mrf.mxu0 }
0x1808   :  { %v1456_v48 = vadd.f32 %v1455_v5, %v3199_v39 }
0x1809   :  { %1517 = vmatmul.f32.gmra.mxu1 %v2865_v35 }
0x180a   :  { %1580 = vst.msk [vmem:[%s3591_s10 + $0x98] sm:$0xff] %vm1561_vm3, %v1456_v48 }
0x180f   :  { %v1458_v11 = vpop.f32.mrf.mxu0 }
0x1810   :  { %v1459_v18 = vadd.f32 %v1458_v11, %v3199_v39 }
0x1811   :  { %1520 = vmatmul.f32.gmra.mxu1 %v2885_v44 }
0x1812   :  { %1582 = vst.msk [vmem:[%s3591_s10 + $0xa8] sm:$0xff] %vm1561_vm3, %v1459_v18 }
0x1817   :  { %v1461_v23 = vpop.f32.mrf.mxu0 }
0x1818   :  { %v1462_v7 = vadd.f32 %v1461_v23, %v3199_v39 }
0x1819   :  { %1523 = vmatmul.f32.gmra.mxu1 %v2905_v54 }
0x181a   :  { %1584 = vst.msk [vmem:[%s3591_s10 + $0xb8] sm:$0xff] %vm1561_vm3, %v1462_v7 }
0x181f   :  { %v1464_v35 = vpop.f32.mrf.mxu0 }
0x1820   :  { %v1465_v24 = vadd.f32 %v1464_v35, %v3199_v39 }
0x1821   :  { %1526 = vmatmul.f32.gmra.mxu1 %v2925_v1 }
0x1822   :  { %1586 = vst.msk [vmem:[%s3591_s10 + $0xc8] sm:$0xff] %vm1561_vm3, %v1465_v24 }
0x1827   :  { %v1467_v44 = vpop.f32.mrf.mxu0 }
0x1828   :  { %v1468_v60 = vadd.f32 %v1467_v44, %v3199_v39 }
0x1829   :  { %1529 = vmatmul.f32.gmra.mxu1 %v2945_v10 }
0x182a   :  { %1588 = vst.msk [vmem:[%s3591_s10 + $0xd8] sm:$0xff] %vm1561_vm3, %v1468_v60 }
0x182f   :  { %v1470_v54 = vpop.f32.mrf.mxu0 }
0x1830   :  { %v1471_v57 = vadd.f32 %v1470_v54, %v3199_v39 }
0x1831   :  { %1532 = vmatmul.f32.gmra.mxu1 %v2965_v26 }
0x1832   :  { %1590 = vst.msk [vmem:[%s3591_s10 + $0xe8] sm:$0xff] %vm1561_vm3, %v1471_v57 }
0x1837   :  { %v1473_v1 = vpop.f32.mrf.mxu0 }
0x1838   :  { %v1474_v32 = vadd.f32 %v1473_v1, %v3199_v39 }
0x1839   :  { %1535 = vmatmul.f32.gmra.mxu1 %v2969_v58 }
0x183a   :  { %1592 = vst.msk [vmem:[%s3591_s10 + $0xf8] sm:$0xff] %vm1561_vm3, %v1474_v32 }
0x183e   :  { %v1151_v10 = vpop.f32.mrf.mxu1 }
0x183f   :  { %v1154_v34 = vadd.f32 %v1151_v10, %v2182_v59  ;;  %v1476_v63 = vpop.f32.mrf.mxu0 }
0x1840   :  { %v1477_v26 = vadd.f32 %v1476_v63, %v3199_v39 }
0x1841   :  { %1780 = vtanh.f32 %v1154_v34  ;;  %1538 = vmatmul.f32.gmra.mxu1 %v2973_v62 }
0x1842   :  { %1594 = vst.msk [vmem:[%s3591_s10 + $0x108] sm:$0xff] %vm1561_vm3, %v1477_v26 }
0x1844   :  { %v1402_v58 = vpop.f32.mrf.mxu3 }
0x1845   :  { %v1403_v41 = vadd.f32 %v1402_v58, %v3104_v2 }
0x1846   :  { %v1494_v43 = vpop.f32.mrf.mxu1 }
0x1847   :  { %v1781_v45 = vpop.eup %1780  ;;  %1643 = vst [vmem:[%s3591_s10 + $0x290] sm:$0xff] %v1403_v41  ;;  %v1495_v36 = vadd.f32 %v1494_v43, %v3199_v39  ;;  %v1479_v47 = vpop.f32.mrf.mxu0 }
0x1848   :  { %v1480_v49 = vadd.f32 %v1479_v47, %v3199_v39  ;;  %1173 = vmatmul.f32.vlgmr.msrb.gmra.mxu2 %v1781_v45  ;;  %1404 = vmatmul.f32.gmra.mxu3 %v1781_v45 }
0x1849   :  { %1606 = vst.msk [vmem:[%s3591_s10 + $0x168] sm:$0xff] %vm1561_vm3, %v1495_v36  ;;  %1541 = vmatmul.f32.gmra.mxu1 %v2998_v25 }
0x184a   :  { %1596 = vst.msk [vmem:[%s3591_s10 + $0x118] sm:$0xff] %vm1561_vm3, %v1480_v49 }
0x184e   :  { %v1497_v62 = vpop.f32.mrf.mxu1 }
0x184f   :  { %v1498_v50 = vadd.f32 %v1497_v62, %v3199_v39  ;;  %v1482_v42 = vpop.f32.mrf.mxu0 }
0x1850   :  { %v1483_v14 = vadd.f32 %v1482_v42, %v3199_v39  ;;  %1278 = vmatmul.f32.vlgmr.msra.gmra.mxu2 %v2185_v61 }
0x1851   :  { %1608 = vst.msk [vmem:[%s3591_s10 + $0x178] sm:$0xff] %vm1561_vm3, %v1498_v50  ;;  %1544 = vmatmul.f32.gmra.mxu1 %v3029_v56 }
0x1852   :  { %1598 = vst.msk [vmem:[%s3591_s10 + $0x128] sm:$0xff] %vm1561_vm3, %v1483_v14 }
0x1856   :  { %v1500_v25 = vpop.f32.mrf.mxu1 }
0x1857   :  { %v1501_v51 = vadd.f32 %v1500_v25, %v3199_v39  ;;  %v1485_v16 = vpop.f32.mrf.mxu0 }
0x1858   :  { %v1486_v17 = vadd.f32 %v1485_v16, %v3199_v39  ;;  %1281 = vmatmul.f32.gmra.mxu2 %v2205_v0 }
0x1859   :  { %1610 = vst.msk [vmem:[%s3591_s10 + $0x188] sm:$0xff] %vm1561_vm3, %v1501_v51  ;;  %1547 = vmatmul.f32.gmra.mxu1 %v3106_v22 }
0x185a   :  { %1600 = vst.msk [vmem:[%s3591_s10 + $0x138] sm:$0xff] %vm1561_vm3, %v1486_v17 }
0x185e   :  { %v1503_v61 = vpop.f32.mrf.mxu1 }
0x185f   :  { %v1504_v56 = vadd.f32 %v1503_v61, %v3199_v39  ;;  %v1488_v31 = vpop.f32.mrf.mxu0 }
0x1860   :  { %v1489_v19 = vadd.f32 %v1488_v31, %v3199_v39  ;;  %1284 = vmatmul.f32.gmra.mxu2 %v2225_v3 }
0x1861   :  { %1612 = vst.msk [vmem:[%s3591_s10 + $0x198] sm:$0xff] %vm1561_vm3, %v1504_v56  ;;  %1550 = vmatmul.f32.gmra.mxu1 %v3201_v53 }
0x1862   :  { %1602 = vst.msk [vmem:[%s3591_s10 + $0x148] sm:$0xff] %vm1561_vm3, %v1489_v19 }
0x1866   :  { %v1506_v0 = vpop.f32.mrf.mxu1 }
0x1867   :  { %v1507_v22 = vadd.f32 %v1506_v0, %v3199_v39  ;;  %v1491_v28 = vpop.f32.mrf.mxu0 }
0x1868   :  { %v1492_v29 = vadd.f32 %v1491_v28, %v3199_v39  ;;  %1287 = vmatmul.f32.gmra.mxu2 %v2245_v6 }
0x1869   :  { %1614 = vst.msk [vmem:[%s3591_s10 + $0x1a8] sm:$0xff] %vm1561_vm3, %v1507_v22  ;;  %1553 = vmatmul.f32.gmra.mxu1 %v1781_v45 }
0x186a   :  { %1604 = vst.msk [vmem:[%s3591_s10 + $0x158] sm:$0xff] %vm1561_vm3, %v1492_v29 }
0x186e   :  { %v1509_v3 = vpop.f32.mrf.mxu1 }
0x186f   :  { %v1510_v53 = vadd.f32 %v1509_v3, %v3199_v39 }
0x1870   :  { %1290 = vmatmul.f32.gmra.mxu2 %v2265_v9 }
0x1871   :  { %1616 = vst.msk [vmem:[%s3591_s10 + $0x1b8] sm:$0xff] %vm1561_vm3, %v1510_v53 }
0x1876   :  { %v1512_v6 = vpop.f32.mrf.mxu1 }
0x1877   :  { %v1513_v38 = vadd.f32 %v1512_v6, %v3199_v39 }
0x1878   :  { %1293 = vmatmul.f32.gmra.mxu2 %v2285_v12 }
0x1879   :  { %1618 = vst.msk [vmem:[%s3591_s10 + $0x1c8] sm:$0xff] %vm1561_vm3, %v1513_v38 }
0x187e   :  { %v1515_v5 = vpop.f32.mrf.mxu1 }
0x187f   :  { %v1516_v48 = vadd.f32 %v1515_v5, %v3199_v39 }
0x1880   :  { %1296 = vmatmul.f32.gmra.mxu2 %v2305_v15 }
0x1881   :  { %1620 = vst.msk [vmem:[%s3591_s10 + $0x1d8] sm:$0xff] %vm1561_vm3, %v1516_v48 }
0x1886   :  { %v1518_v9 = vpop.f32.mrf.mxu1 }
0x1887   :  { %v1519_v11 = vadd.f32 %v1518_v9, %v3199_v39 }
0x1888   :  { %1299 = vmatmul.f32.gmra.mxu2 %v2325_v21 }
0x1889   :  { %1622 = vst.msk [vmem:[%s3591_s10 + $0x1e8] sm:$0xff] %vm1561_vm3, %v1519_v11 }
0x188e   :  { %v1521_v12 = vpop.f32.mrf.mxu1 }
0x188f   :  { %v1522_v18 = vadd.f32 %v1521_v12, %v3199_v39 }
0x1890   :  { %1302 = vmatmul.f32.gmra.mxu2 %v2345_v27 }
0x1891   :  { %1624 = vst.msk [vmem:[%s3591_s10 + $0x1f8] sm:$0xff] %vm1561_vm3, %v1522_v18 }
0x1896   :  { %v1524_v15 = vpop.f32.mrf.mxu1 }
0x1897   :  { %v1525_v23 = vadd.f32 %v1524_v15, %v3199_v39 }
0x1898   :  { %1305 = vmatmul.f32.gmra.mxu2 %v2365_v33 }
0x1899   :  { %1626 = vst.msk [vmem:[%s3591_s10 + $0x208] sm:$0xff] %vm1561_vm3, %v1525_v23 }
0x189e   :  { %v1527_v21 = vpop.f32.mrf.mxu1 }
0x189f   :  { %v1528_v7 = vadd.f32 %v1527_v21, %v3199_v39 }
0x18a0   :  { %1308 = vmatmul.f32.gmra.mxu2 %v2385_v37 }
0x18a1   :  { %1628 = vst.msk [vmem:[%s3591_s10 + $0x218] sm:$0xff] %vm1561_vm3, %v1528_v7 }
0x18a6   :  { %v1530_v27 = vpop.f32.mrf.mxu1 }
0x18a7   :  { %v1531_v35 = vadd.f32 %v1530_v27, %v3199_v39 }
0x18a8   :  { %1311 = vmatmul.f32.gmra.mxu2 %v2405_v40 }
0x18a9   :  { %1630 = vst.msk [vmem:[%s3591_s10 + $0x228] sm:$0xff] %vm1561_vm3, %v1531_v35 }
0x18ae   :  { %v1533_v33 = vpop.f32.mrf.mxu1 }
0x18af   :  { %v1534_v24 = vadd.f32 %v1533_v33, %v3199_v39 }
0x18b0   :  { %1314 = vmatmul.f32.gmra.mxu2 %v2425_v46 }
0x18b1   :  { %1632 = vst.msk [vmem:[%s3591_s10 + $0x238] sm:$0xff] %vm1561_vm3, %v1534_v24 }
0x18b6   :  { %v1536_v37 = vpop.f32.mrf.mxu1 }
0x18b7   :  { %v1537_v44 = vadd.f32 %v1536_v37, %v3199_v39 }
0x18b8   :  { %1317 = vmatmul.f32.gmra.mxu2 %v2445_v52 }
0x18b9   :  { %1634 = vst.msk [vmem:[%s3591_s10 + $0x248] sm:$0xff] %vm1561_vm3, %v1537_v44 }
0x18be   :  { %v1539_v40 = vpop.f32.mrf.mxu1 }
0x18bf   :  { %v1540_v60 = vadd.f32 %v1539_v40, %v3199_v39 }
0x18c0   :  { %1320 = vmatmul.f32.gmra.mxu2 %v2465_v55 }
0x18c1   :  { %1636 = vst.msk [vmem:[%s3591_s10 + $0x258] sm:$0xff] %vm1561_vm3, %v1540_v60 }
0x18c6   :  { %v1542_v46 = vpop.f32.mrf.mxu1 }
0x18c7   :  { %v1543_v54 = vadd.f32 %v1542_v46, %v3199_v39 }
0x18c8   :  { %1323 = vmatmul.f32.gmra.mxu2 %v2485_v20 }
0x18c9   :  { %1638 = vst.msk [vmem:[%s3591_s10 + $0x268] sm:$0xff] %vm1561_vm3, %v1543_v54 }
0x18cb   :  { %v1174_v52 = vpop.f32.mrf.mxu2  ;;  %v1405_v57 = vpop.f32.mrf.mxu3 }
0x18cc   :  { %v1177_v1 = vadd.f32 %v1174_v52, %v2182_v59  ;;  %v1406_v55 = vadd.f32 %v1405_v57, %v3104_v2 }
0x18ce   :  { %1782 = vtanh.f32 %v1177_v1  ;;  %1645 = vst [vmem:[%s3591_s10 + $0x2a0] sm:$0xff] %v1406_v55  ;;  %v1545_v32 = vpop.f32.mrf.mxu1 }
0x18cf   :  { %v1546_v10 = vadd.f32 %v1545_v32, %v3199_v39 }
0x18d0   :  { %1326 = vmatmul.f32.gmra.mxu2 %v2535_v30 }
0x18d1   :  { %1640 = vst.msk [vmem:[%s3591_s10 + $0x278] sm:$0xff] %vm1561_vm3, %v1546_v10 }
0x18d3   :  { %v1279_v20 = vpop.f32.mrf.mxu2 }
0x18d4   :  { %v1783_v34 = vpop.eup %1782  ;;  %v1280_v59 = vadd.f32 %v1279_v20, %v3104_v2 }
0x18d5   :  { %1407 = vmatmul.f32.gmra.mxu3 %v1783_v34  ;;  %1556 = vmatmul.f32.gmra.mxu1 %v1783_v34 }
0x18d6   :  { %1560 = vst [vmem:[%s3591_s10] sm:$0xff] %v1280_v59  ;;  %v1548_v63 = vpop.f32.mrf.mxu1 }
0x18d7   :  { %v1549_v26 = vadd.f32 %v1548_v63, %v3199_v39 }
0x18d8   :  { %1329 = vmatmul.f32.gmra.mxu2 %v2575_v4 }
0x18d9   :  { %1642 = vst.msk [vmem:[%s3591_s10 + $0x288] sm:$0xff] %vm1561_vm3, %v1549_v26 }
0x18db   :  { %v1282_v30 = vpop.f32.mrf.mxu2 }
0x18dc   :  { %v1283_v58 = vadd.f32 %v1282_v30, %v3104_v2 }
0x18de   :  { %1563 = vst [vmem:[%s3591_s10 + $0x10] sm:$0xff] %v1283_v58  ;;  %v1551_v41 = vpop.f32.mrf.mxu1 }
0x18df   :  { %v1552_v43 = vadd.f32 %v1551_v41, %v3199_v39 }
0x18e0   :  { %1332 = vmatmul.f32.gmra.mxu2 %v2600_v8 }
0x18e1   :  { %1644 = vst.msk [vmem:[%s3591_s10 + $0x298] sm:$0xff] %vm1561_vm3, %v1552_v43 }
0x18e3   :  { %v1285_v4 = vpop.f32.mrf.mxu2 }
0x18e4   :  { %v1286_v45 = vadd.f32 %v1285_v4, %v3104_v2 }
0x18e6   :  { %1565 = vst [vmem:[%s3591_s10 + $0x20] sm:$0xff] %v1286_v45  ;;  %v1554_v36 = vpop.f32.mrf.mxu1 }
0x18e7   :  { %v1555_v47 = vadd.f32 %v1554_v36, %v3199_v39 }
0x18e8   :  { %1335 = vmatmul.f32.gmra.mxu2 %v2640_v13 }
0x18e9   :  { %1646 = vst.msk [vmem:[%s3591_s10 + $0x2a8] sm:$0xff] %vm1561_vm3, %v1555_v47 }
0x18eb   :  { %v1288_v8 = vpop.f32.mrf.mxu2 }
0x18ec   :  { %v1289_v49 = vadd.f32 %v1288_v8, %v3104_v2 }
0x18ee   :  { %1567 = vst [vmem:[%s3591_s10 + $0x30] sm:$0xff] %v1289_v49 }
0x18f3   :  { %v1291_v62 = vpop.f32.mrf.mxu2 }
0x18f4   :  { %v1292_v50 = vadd.f32 %v1291_v62, %v3104_v2 }
0x18f6   :  { %1569 = vst [vmem:[%s3591_s10 + $0x40] sm:$0xff] %v1292_v50 }
0x18fb   :  { %v1294_v13 = vpop.f32.mrf.mxu2 }
0x18fc   :  { %v1295_v42 = vadd.f32 %v1294_v13, %v3104_v2 }
0x18fe   :  { %1571 = vst [vmem:[%s3591_s10 + $0x50] sm:$0xff] %v1295_v42 }
0x1903   :  { %v1297_v14 = vpop.f32.mrf.mxu2 }
0x1904   :  { %v1298_v25 = vadd.f32 %v1297_v14, %v3104_v2 }
0x1906   :  { %1573 = vst [vmem:[%s3591_s10 + $0x60] sm:$0xff] %v1298_v25 }
0x190b   :  { %v1300_v51 = vpop.f32.mrf.mxu2 }
0x190c   :  { %v1301_v16 = vadd.f32 %v1300_v51, %v3104_v2 }
0x190e   :  { %1575 = vst [vmem:[%s3591_s10 + $0x70] sm:$0xff] %v1301_v16 }
0x1913   :  { %v1303_v17 = vpop.f32.mrf.mxu2 }
0x1914   :  { %v1304_v61 = vadd.f32 %v1303_v17, %v3104_v2 }
0x1916   :  { %1577 = vst [vmem:[%s3591_s10 + $0x80] sm:$0xff] %v1304_v61 }
0x191b   :  { %v1306_v56 = vpop.f32.mrf.mxu2 }
0x191c   :  { %v1307_v31 = vadd.f32 %v1306_v56, %v3104_v2 }
0x191e   :  { %1579 = vst [vmem:[%s3591_s10 + $0x90] sm:$0xff] %v1307_v31 }
0x1923   :  { %v1309_v19 = vpop.f32.mrf.mxu2 }
0x1924   :  { %v1310_v0 = vadd.f32 %v1309_v19, %v3104_v2 }
0x1926   :  { %1581 = vst [vmem:[%s3591_s10 + $0xa0] sm:$0xff] %v1310_v0 }
0x192b   :  { %v1312_v22 = vpop.f32.mrf.mxu2 }
0x192c   :  { %v1313_v28 = vadd.f32 %v1312_v22, %v3104_v2 }
0x192e   :  { %1583 = vst [vmem:[%s3591_s10 + $0xb0] sm:$0xff] %v1313_v28 }
0x1933   :  { %v1315_v29 = vpop.f32.mrf.mxu2 }
0x1934   :  { %v1316_v3 = vadd.f32 %v1315_v29, %v3104_v2 }
0x1936   :  { %1585 = vst [vmem:[%s3591_s10 + $0xc0] sm:$0xff] %v1316_v3 }
0x193b   :  { %v1318_v53 = vpop.f32.mrf.mxu2 }
0x193c   :  { %v1319_v6 = vadd.f32 %v1318_v53, %v3104_v2 }
0x193e   :  { %1587 = vst [vmem:[%s3591_s10 + $0xd0] sm:$0xff] %v1319_v6 }
0x1943   :  { %v1321_v38 = vpop.f32.mrf.mxu2 }
0x1944   :  { %v1322_v5 = vadd.f32 %v1321_v38, %v3104_v2 }
0x1946   :  { %1589 = vst [vmem:[%s3591_s10 + $0xe0] sm:$0xff] %v1322_v5 }
0x194b   :  { %v1324_v48 = vpop.f32.mrf.mxu2 }
0x194c   :  { %v1325_v9 = vadd.f32 %v1324_v48, %v3104_v2 }
0x194e   :  { %1591 = vst [vmem:[%s3591_s10 + $0xf0] sm:$0xff] %v1325_v9 }
0x1952   :  { %v1557_v11 = vpop.f32.mrf.mxu1 }
0x1953   :  { %v1558_v12 = vadd.f32 %v1557_v11, %v3199_v39  ;;  %v1327_v18 = vpop.f32.mrf.mxu2 }
0x1954   :  { %v1328_v15 = vadd.f32 %v1327_v18, %v3104_v2 }
0x1955   :  { %1648 = vst.msk [vmem:[%s3591_s10 + $0x2b8] sm:$0xff] %vm1561_vm3, %v1558_v12 }
0x1956   :  { %1593 = vst [vmem:[%s3591_s10 + $0x100] sm:$0xff] %v1328_v15 }
0x1958   :  { %v1408_v23 = vpop.f32.mrf.mxu3 }
0x1959   :  { %v1409_v21 = vadd.f32 %v1408_v23, %v3104_v2 }
0x195b   :  { %1647 = vst [vmem:[%s3591_s10 + $0x2b0] sm:$0xff] %v1409_v21  ;;  %v1330_v39 = vpop.f32.mrf.mxu2 }
0x195c   :  { %v1331_v7 = vadd.f32 %v1330_v39, %v3104_v2 }
0x195e   :  { %1595 = vst [vmem:[%s3591_s10 + $0x110] sm:$0xff] %v1331_v7 }
0x1963   :  { %v1333_v27 = vpop.f32.mrf.mxu2 }
0x1964   :  { %v1334_v35 = vadd.f32 %v1333_v27, %v3104_v2 }
0x1966   :  { %1597 = vst [vmem:[%s3591_s10 + $0x120] sm:$0xff] %v1334_v35 }
0x196b   :  { %v1336_v33 = vpop.f32.mrf.mxu2 }
0x196c   :  { %v1337_v24 = vadd.f32 %v1336_v33, %v3104_v2 }
0x196e   :  { %1599 = vst [vmem:[%s3591_s10 + $0x130] sm:$0xff] %v1337_v24 }

</bundles_post_ra>
